<compile_context>
chip_gen: v7x
topology: tpu7x:2x2x1
jax: 0.10.0
libtpu: 0.0.40
codegen_flags: <defaults>
</compile_context>

<pallas_src>
import jax
import jax.numpy as jnp
from jax.experimental import pallas as pl
from jax.experimental.pallas import tpu as pltpu


def _round_up(x, m):
    return (x + m - 1) // m * m


# ----------------------- fused LSTM + f_star kernel -------------------------
def rmtpp_kernel(p_ref, delta_ref, mask_ref, aux_ref, whh_ref, wvt_ref,
                 past_ref, sum_ref, h_sc, c_sc):
    """One grid step = TC timesteps of the LSTM recurrence + fused f_star."""
    chunk = pl.program_id(0)
    H = h_sc.shape[1]
    tc = p_ref.shape[0]

    @pl.when(chunk == 0)
    def _():
        h_sc[...] = jnp.zeros_like(h_sc)
        c_sc[...] = jnp.zeros_like(c_sc)
        sum_ref[...] = jnp.zeros_like(sum_ref)

    whh = whh_ref[...]            # (H, 4H)  loaded once per chunk
    wvt = wvt_ref[...]            # (1, H)   fc_vt weight row

    def step(t, carry):
        h, c = carry
        # gate pre-activations: hoisted input projection + recurrent matmul.
        gates = p_ref[t] + jnp.dot(h, whh, preferred_element_type=jnp.float32)
        i_g = jax.nn.sigmoid(gates[:, 0 * H:1 * H])
        f_g = jax.nn.sigmoid(gates[:, 1 * H:2 * H])
        g_g = jnp.tanh(gates[:, 2 * H:3 * H])
        o_g = jax.nn.sigmoid(gates[:, 3 * H:4 * H])
        c_new = f_g * c + i_g * g_g
        h_new = o_g * jnp.tanh(c_new)
        # fc_vt (bias added in the epilogue).  Multiplying by mask after the
        # reduce == zeroing the hidden state (pad_packed_sequence emulation),
        # without a lane->sublane relayout per step.
        past_ref[t, :] = jnp.sum(h_new * wvt, axis=-1) * mask_ref[t]
        return (h_new, c_new)

    h_fin, c_fin = jax.lax.fori_loop(0, tc, step, (h_sc[...], c_sc[...]),
                                     unroll=True)
    h_sc[...] = h_fin
    c_sc[...] = c_fin

    # Vectorized f_star over the whole (tc, B) chunk.
    aux = aux_ref[...]            # (2, B): row 0 = b_vt, row 1 = w_t
    b_vt = aux[0:1, :]
    w_t = aux[1:2, :]
    mask = mask_ref[...]
    z = past_ref[...] + b_vt
    past = jnp.where(z > 0, z, jnp.exp(jnp.minimum(z, 0.0)) - 1.0)   # ELU(1)
    current = w_t * delta_ref[...]
    inv_wt = 1.0 / w_t
    term = past + current + (jnp.exp(past) - jnp.exp(past + current)) * inv_wt
    past_ref[...] = past
    sum_ref[...] += jnp.sum(term * mask)


def run_rmtpp_fused(p, delta_tb, mask_tb, aux, whh_t, wvt, *, tc):
    t_pad, b_pad, g4 = p.shape
    h = whh_t.shape[0]
    n_chunks = t_pad // tc
    grid_spec = pltpu.PrefetchScalarGridSpec(
        num_scalar_prefetch=0,
        grid=(n_chunks,),
        in_specs=[
            pl.BlockSpec((tc, b_pad, g4), lambda c: (c, 0, 0)),   # input proj
            pl.BlockSpec((tc, b_pad), lambda c: (c, 0)),          # delta (T-major)
            pl.BlockSpec((tc, b_pad), lambda c: (c, 0)),          # mask  (T-major)
            pl.BlockSpec((2, b_pad), lambda c: (0, 0)),           # [b_vt; w_t]
            pl.BlockSpec((h, g4), lambda c: (0, 0)),              # W_hh^T
            pl.BlockSpec((1, h), lambda c: (0, 0)),               # fc_vt weight
        ],
        out_specs=(
            pl.BlockSpec((tc, b_pad), lambda c: (c, 0)),          # past (T-major)
            pl.BlockSpec((1, 1), lambda c: (0, 0)),               # resident sum
        ),
        scratch_shapes=[
            pltpu.VMEM((b_pad, h), jnp.float32),                  # h carry
            pltpu.VMEM((b_pad, h), jnp.float32),                  # c carry
        ],
    )
    return pl.pallas_call(
        rmtpp_kernel,
        out_shape=(jax.ShapeDtypeStruct((t_pad, b_pad), jnp.float32),
                   jax.ShapeDtypeStruct((1, 1), jnp.float32)),
        grid_spec=grid_spec,
        compiler_params=pltpu.CompilerParams(
            dimension_semantics=("arbitrary",)),                  # recurrence
    )(p, delta_tb, mask_tb, aux, whh_t, wvt)


# ----------------------------- parameter init -------------------------------
def orthogonal_init(key, shape):
    n, m = shape
    a = jax.random.normal(key, (max(n, m), min(n, m)), dtype=jnp.float32)
    q, r = jnp.linalg.qr(a)
    q = q * jnp.sign(jnp.diagonal(r))[None, :]
    if n < m:
        q = q.T
    return q[:n, :m].astype(jnp.float32)


def init_params(key, feature_size, hidden_size):
    k = jax.random.split(key, 6)
    H = hidden_size
    return {
        # LSTM (PyTorch layout): weight_ih_l0 (4H, F), weight_hh_l0 (4H, H)
        "w_ih": orthogonal_init(k[0], (4 * H, feature_size)),
        "w_hh": orthogonal_init(k[1], (4 * H, H)),
        "b_ih": jnp.zeros((4 * H,), jnp.float32),   # nn.init.constant_(bias, 0)
        "b_hh": jnp.zeros((4 * H,), jnp.float32),
        # fc_vt: Linear(H, 1) default init
        "w_vt": jax.random.uniform(k[2], (1, H), jnp.float32,
                                   -1.0 / jnp.sqrt(H), 1.0 / jnp.sqrt(H)),
        "b_vt": jax.random.uniform(k[3], (1,), jnp.float32,
                                   -1.0 / jnp.sqrt(H), 1.0 / jnp.sqrt(H)),
        # w_t = torch.rand(1)
        "w_t": jax.random.uniform(k[4], (1,), jnp.float32),
    }


# ----------------------------- forward (wrapper) ----------------------------
@jax.jit
def rmtpp_forward(params, input_seq, delta_seq, lens):
    """input_seq: (B, T, F), delta_seq: (B, T), lens: (B,) int. T == max(lens)."""
    B, T, F = input_seq.shape
    H = params["w_hh"].shape[1]

    b_pad = _round_up(B, 8)                 # full f32 sublane occupancy
    tc = min(64, _round_up(T, 8))           # timesteps per grid step
    t_pad = _round_up(T, tc)

    lens_p = jnp.zeros((b_pad,), jnp.int32).at[:B].set(lens.astype(jnp.int32))
    mask_tb = (jnp.arange(t_pad)[:, None] < lens_p[None, :]).astype(jnp.float32)

    # Time-major, batch-padded input (only the small F-wide tensor is moved).
    x = jnp.zeros((t_pad, b_pad, F), jnp.float32)
    x = x.at[:T, :B, :].set(jnp.transpose(input_seq, (1, 0, 2)).astype(jnp.float32))

    # Hoisted input projection: one big matmul instead of T tiny per-step ones.
    wih_t = params["w_ih"].T.astype(jnp.float32)              # (F, 4H)
    whh_t = params["w_hh"].T.astype(jnp.float32)              # (H, 4H)
    bias = (params["b_ih"] + params["b_hh"]).astype(jnp.float32)
    p = jnp.dot(x, wih_t) + bias                              # (t_pad, b_pad, 4H)

    delta_tb = jnp.zeros((t_pad, b_pad), jnp.float32)
    delta_tb = delta_tb.at[:T, :B].set(delta_seq.T.astype(jnp.float32))

    aux = jnp.stack([
        jnp.broadcast_to(params["b_vt"].astype(jnp.float32), (b_pad,)),
        jnp.broadcast_to(params["w_t"].astype(jnp.float32), (b_pad,)),
    ])                                                        # (2, b_pad)
    wvt = params["w_vt"].astype(jnp.float32)                  # (1, H)

    past_tb, fsum = run_rmtpp_fused(p, delta_tb, mask_tb, aux, whh_t, wvt, tc=tc)
    past = past_tb.T[:B, :T]
    return -fsum[0, 0], past, params["w_t"]


# ----------------------------- pure-JAX reference ---------------------------
def rmtpp_reference(params, input_seq, delta_seq, lens):
    B, T, _ = input_seq.shape
    H = params["w_hh"].shape[1]
    mask = (jnp.arange(T)[None, :] < lens[:, None]).astype(jnp.float32)

    def step(carry, x_t):
        h, c = carry
        gates = x_t @ params["w_ih"].T + h @ params["w_hh"].T \
            + params["b_ih"] + params["b_hh"]
        i = jax.nn.sigmoid(gates[:, 0 * H:1 * H])
        f = jax.nn.sigmoid(gates[:, 1 * H:2 * H])
        g = jnp.tanh(gates[:, 2 * H:3 * H])
        o = jax.nn.sigmoid(gates[:, 3 * H:4 * H])
        c = f * c + i * g
        h = o * jnp.tanh(c)
        return (h, c), h

    h0 = jnp.zeros((B, H), jnp.float32)
    _, hs = jax.lax.scan(step, (h0, h0), jnp.transpose(input_seq, (1, 0, 2)))
    hidden = jnp.transpose(hs, (1, 0, 2)) * mask[:, :, None]

    z = hidden @ params["w_vt"][0] + params["b_vt"][0]
    past = jnp.where(z > 0, z, jnp.exp(jnp.minimum(z, 0.0)) - 1.0)
    w_t = params["w_t"][0]
    current = w_t * delta_seq
    term = past + current + jnp.exp(past) / w_t - jnp.exp(past + current) / w_t
    fstar = jnp.sum(term * mask)
    return -fstar, past, params["w_t"]


# ----------------------------- main ------------------------------------------
if __name__ == "__main__":
    B, T, F, H = 2, 8, 4, 32
    key = jax.random.PRNGKey(0)
    k_par, k_x, k_d = jax.random.split(key, 3)

    params = init_params(k_par, feature_size=F, hidden_size=H)
    input_seq = jax.random.normal(k_x, (B, T, F), jnp.float32)
    delta_seq = jax.random.uniform(k_d, (B, T), jnp.float32)
    lens = jnp.array([T, 5], dtype=jnp.int32)  # max(lens) == T

    neg_ll, past, w_t = rmtpp_forward(params, input_seq, delta_seq, lens)
    jax.block_until_ready((neg_ll, past, w_t))

    ref_neg_ll, ref_past, _ = rmtpp_reference(params, input_seq, delta_seq, lens)
    assert jnp.allclose(neg_ll, ref_neg_ll, atol=1e-4, rtol=1e-4), (neg_ll, ref_neg_ll)
    assert jnp.allclose(past, ref_past, atol=1e-4, rtol=1e-4)

    print("KERNEL_OK")
</pallas_src>

<mosaic_0001>
module attributes {stable_mosaic.version = 11 : i64} {
  func.func @rmtpp_kernel(%arg0: i32, %arg1: memref<8x8x128xf32, #tpu.memory_space<vmem>>, %arg2: memref<8x8xf32, #tpu.memory_space<vmem>>, %arg3: memref<8x8xf32, #tpu.memory_space<vmem>>, %arg4: memref<2x8xf32, #tpu.memory_space<vmem>>, %arg5: memref<32x128xf32, #tpu.memory_space<vmem>>, %arg6: memref<1x32xf32, #tpu.memory_space<vmem>>, %arg7: memref<8x8xf32, #tpu.memory_space<vmem>>, %arg8: memref<1x1xf32, #tpu.memory_space<vmem>>, %arg9: memref<8x32xf32, #tpu.memory_space<vmem>>, %arg10: memref<8x32xf32, #tpu.memory_space<vmem>>) attributes {dimension_semantics = [#tpu.dimension_semantics<arbitrary>], iteration_bounds = array<i64: 1>, scalar_prefetch = 0 : i64, scratch_operands = 2 : i64, tpu.core_type = #tpu.core_type<tc>, window_params = [{transform_indices = @transform_0, window_bounds = array<i64: 8, 8, 128>}, {transform_indices = @transform_1, window_bounds = array<i64: 8, 8>}, {transform_indices = @transform_2, window_bounds = array<i64: 8, 8>}, {pipeline_mode = #tpu.pipeline_mode<synchronous>, transform_indices = @transform_3, window_bounds = array<i64: 2, 8>}, {pipeline_mode = #tpu.pipeline_mode<synchronous>, transform_indices = @transform_4, window_bounds = array<i64: 32, 128>}, {pipeline_mode = #tpu.pipeline_mode<synchronous>, transform_indices = @transform_5, window_bounds = array<i64: 1, 32>}, {transform_indices = @transform_6, window_bounds = array<i64: 8, 8>}, {pipeline_mode = #tpu.pipeline_mode<synchronous>, transform_indices = @transform_7, window_bounds = array<i64: 1, 1>}]} {
    %c0_i32 = arith.constant 0 : i32
    %0 = arith.cmpi eq, %arg0, %c0_i32 : i32
    %1 = arith.extui %0 : i1 to i32
    %c0_i32_0 = arith.constant 0 : i32
    %2 = arith.cmpi ne, %1, %c0_i32_0 : i32
    scf.if %2 {
      %cst_103 = arith.constant 0.000000e+00 : f32
      %375 = vector.broadcast %cst_103 : f32 to vector<8x32xf32>
      %c0_104 = arith.constant 0 : index
      %c0_105 = arith.constant 0 : index
      %376 = vector.load %arg9[%c0_104, %c0_105] : memref<8x32xf32, #tpu.memory_space<vmem>>, vector<8x32xf32>
      tpu.vector_store %arg9[%c0_104, %c0_105], %375 {strides = array<i32>} : memref<8x32xf32, #tpu.memory_space<vmem>>, vector<8x32xf32>,
      %cst_106 = arith.constant 0.000000e+00 : f32
      %377 = vector.broadcast %cst_106 : f32 to vector<8x32xf32>
      %c0_107 = arith.constant 0 : index
      %c0_108 = arith.constant 0 : index
      %378 = vector.load %arg10[%c0_107, %c0_108] : memref<8x32xf32, #tpu.memory_space<vmem>>, vector<8x32xf32>
      tpu.vector_store %arg10[%c0_107, %c0_108], %377 {strides = array<i32>} : memref<8x32xf32, #tpu.memory_space<vmem>>, vector<8x32xf32>,
      %cst_109 = arith.constant 0.000000e+00 : f32
      %379 = vector.broadcast %cst_109 : f32 to vector<1x1xf32>
      %c0_110 = arith.constant 0 : index
      %c0_111 = arith.constant 0 : index
      %380 = vector.load %arg8[%c0_110, %c0_111] : memref<1x1xf32, #tpu.memory_space<vmem>>, vector<1x1xf32>
      tpu.vector_store %arg8[%c0_110, %c0_111], %379 {strides = array<i32>} : memref<1x1xf32, #tpu.memory_space<vmem>>, vector<1x1xf32>,
    } else {
    }
    %c0 = arith.constant 0 : index
    %c0_1 = arith.constant 0 : index
    %3 = vector.load %arg5[%c0, %c0_1] : memref<32x128xf32, #tpu.memory_space<vmem>>, vector<32x128xf32>
    %c0_2 = arith.constant 0 : index
    %c0_3 = arith.constant 0 : index
    %4 = vector.load %arg6[%c0_2, %c0_3] : memref<1x32xf32, #tpu.memory_space<vmem>>, vector<1x32xf32>
    %c0_4 = arith.constant 0 : index
    %c0_5 = arith.constant 0 : index
    %5 = vector.load %arg9[%c0_4, %c0_5] : memref<8x32xf32, #tpu.memory_space<vmem>>, vector<8x32xf32>
    %c0_6 = arith.constant 0 : index
    %c0_7 = arith.constant 0 : index
    %6 = vector.load %arg10[%c0_6, %c0_7] : memref<8x32xf32, #tpu.memory_space<vmem>>, vector<8x32xf32>
    %c0_i32_8 = arith.constant 0 : i32
    %7 = arith.index_cast %c0_i32_8 : i32 to index
    %c0_9 = arith.constant 0 : index
    %c0_10 = arith.constant 0 : index
    %8 = vector.load %arg1[%7, %c0_9, %c0_10] : memref<8x8x128xf32, #tpu.memory_space<vmem>>, vector<1x8x128xf32>
    %9 = vector.shape_cast %8 : vector<1x8x128xf32> to vector<8x128xf32>
    %cst = arith.constant dense<0.000000e+00> : vector<8x128xf32>
    %10 = tpu.matmul %5, %3, %cst {dimension_numbers = #tpu.dot_dimension_numbers<[1], [0], [0], [1], [0, 0, 1, 1], [], []>} : vector<8x32xf32>, vector<32x128xf32>, vector<8x128xf32> -> vector<8x128xf32>
    %11 = arith.addf %9, %10 : vector<8x128xf32>
    %12 = vector.extract_strided_slice %11 {offsets = [0, 0], sizes = [8, 32], strides = [1, 1]} : vector<8x128xf32> to vector<8x32xf32>
    %13 = arith.negf %12 : vector<8x32xf32>
    %14 = math.exp %13 : vector<8x32xf32>
    %cst_11 = arith.constant 1.000000e+00 : f32
    %15 = vector.broadcast %cst_11 : f32 to vector<8x32xf32>
    %16 = arith.addf %15, %14 : vector<8x32xf32>
    %17 = arith.divf %15, %16 : vector<8x32xf32>
    %18 = vector.extract_strided_slice %11 {offsets = [0, 32], sizes = [8, 32], strides = [1, 1]} : vector<8x128xf32> to vector<8x32xf32>
    %19 = arith.negf %18 : vector<8x32xf32>
    %20 = math.exp %19 : vector<8x32xf32>
    %cst_12 = arith.constant 1.000000e+00 : f32
    %21 = vector.broadcast %cst_12 : f32 to vector<8x32xf32>
    %22 = arith.addf %21, %20 : vector<8x32xf32>
    %23 = arith.divf %21, %22 : vector<8x32xf32>
    %24 = vector.extract_strided_slice %11 {offsets = [0, 64], sizes = [8, 32], strides = [1, 1]} : vector<8x128xf32> to vector<8x32xf32>
    %25 = math.tanh %24 : vector<8x32xf32>
    %26 = vector.extract_strided_slice %11 {offsets = [0, 96], sizes = [8, 32], strides = [1, 1]} : vector<8x128xf32> to vector<8x32xf32>
    %27 = arith.negf %26 : vector<8x32xf32>
    %28 = math.exp %27 : vector<8x32xf32>
    %cst_13 = arith.constant 1.000000e+00 : f32
    %29 = vector.broadcast %cst_13 : f32 to vector<8x32xf32>
    %30 = arith.addf %29, %28 : vector<8x32xf32>
    %31 = arith.divf %29, %30 : vector<8x32xf32>
    %32 = arith.mulf %23, %6 : vector<8x32xf32>
    %33 = arith.mulf %17, %25 : vector<8x32xf32>
    %34 = arith.addf %32, %33 : vector<8x32xf32>
    %35 = math.tanh %34 : vector<8x32xf32>
    %36 = arith.mulf %31, %35 : vector<8x32xf32>
    %37 = vector.broadcast %4 : vector<1x32xf32> to vector<8x32xf32>
    %38 = arith.mulf %36, %37 : vector<8x32xf32>
    %cst_14 = arith.constant dense<0.000000e+00> : vector<8xf32>
    %39 = vector.multi_reduction <add>, %38, %cst_14 [1] : vector<8x32xf32> to vector<8xf32>
    %40 = arith.index_cast %c0_i32_8 : i32 to index
    %c0_15 = arith.constant 0 : index
    %41 = vector.load %arg3[%40, %c0_15] : memref<8x8xf32, #tpu.memory_space<vmem>>, vector<1x8xf32>
    %42 = vector.shape_cast %41 : vector<1x8xf32> to vector<8xf32>
    %43 = arith.mulf %39, %42 : vector<8xf32>
    %44 = arith.index_cast %c0_i32_8 : i32 to index
    %c0_16 = arith.constant 0 : index
    %45 = vector.load %arg7[%44, %c0_16] : memref<8x8xf32, #tpu.memory_space<vmem>>, vector<1x8xf32>
    %46 = vector.shape_cast %45 : vector<1x8xf32> to vector<8xf32>
    %47 = vector.shape_cast %43 : vector<8xf32> to vector<1x8xf32>
    tpu.vector_store %arg7[%44, %c0_16], %47 {strides = array<i32>} : memref<8x8xf32, #tpu.memory_space<vmem>>, vector<1x8xf32>,
    %c1_i32 = arith.constant 1 : i32
    %48 = arith.index_cast %c1_i32 : i32 to index
    %c0_17 = arith.constant 0 : index
    %c0_18 = arith.constant 0 : index
    %49 = vector.load %arg1[%48, %c0_17, %c0_18] : memref<8x8x128xf32, #tpu.memory_space<vmem>>, vector<1x8x128xf32>
    %50 = vector.shape_cast %49 : vector<1x8x128xf32> to vector<8x128xf32>
    %cst_19 = arith.constant dense<0.000000e+00> : vector<8x128xf32>
    %51 = tpu.matmul %36, %3, %cst_19 {dimension_numbers = #tpu.dot_dimension_numbers<[1], [0], [0], [1], [0, 0, 1, 1], [], []>} : vector<8x32xf32>, vector<32x128xf32>, vector<8x128xf32> -> vector<8x128xf32>
    %52 = arith.addf %50, %51 : vector<8x128xf32>
    %53 = vector.extract_strided_slice %52 {offsets = [0, 0], sizes = [8, 32], strides = [1, 1]} : vector<8x128xf32> to vector<8x32xf32>
    %54 = arith.negf %53 : vector<8x32xf32>
    %55 = math.exp %54 : vector<8x32xf32>
    %cst_20 = arith.constant 1.000000e+00 : f32
    %56 = vector.broadcast %cst_20 : f32 to vector<8x32xf32>
    %57 = arith.addf %56, %55 : vector<8x32xf32>
    %58 = arith.divf %56, %57 : vector<8x32xf32>
    %59 = vector.extract_strided_slice %52 {offsets = [0, 32], sizes = [8, 32], strides = [1, 1]} : vector<8x128xf32> to vector<8x32xf32>
    %60 = arith.negf %59 : vector<8x32xf32>
    %61 = math.exp %60 : vector<8x32xf32>
    %cst_21 = arith.constant 1.000000e+00 : f32
    %62 = vector.broadcast %cst_21 : f32 to vector<8x32xf32>
    %63 = arith.addf %62, %61 : vector<8x32xf32>
    %64 = arith.divf %62, %63 : vector<8x32xf32>
    %65 = vector.extract_strided_slice %52 {offsets = [0, 64], sizes = [8, 32], strides = [1, 1]} : vector<8x128xf32> to vector<8x32xf32>
    %66 = math.tanh %65 : vector<8x32xf32>
    %67 = vector.extract_strided_slice %52 {offsets = [0, 96], sizes = [8, 32], strides = [1, 1]} : vector<8x128xf32> to vector<8x32xf32>
    %68 = arith.negf %67 : vector<8x32xf32>
    %69 = math.exp %68 : vector<8x32xf32>
    %cst_22 = arith.constant 1.000000e+00 : f32
    %70 = vector.broadcast %cst_22 : f32 to vector<8x32xf32>
    %71 = arith.addf %70, %69 : vector<8x32xf32>
    %72 = arith.divf %70, %71 : vector<8x32xf32>
    %73 = arith.mulf %64, %34 : vector<8x32xf32>
    %74 = arith.mulf %58, %66 : vector<8x32xf32>
    %75 = arith.addf %73, %74 : vector<8x32xf32>
    %76 = math.tanh %75 : vector<8x32xf32>
    %77 = arith.mulf %72, %76 : vector<8x32xf32>
    %78 = vector.broadcast %4 : vector<1x32xf32> to vector<8x32xf32>
    %79 = arith.mulf %77, %78 : vector<8x32xf32>
    %cst_23 = arith.constant dense<0.000000e+00> : vector<8xf32>
    %80 = vector.multi_reduction <add>, %79, %cst_23 [1] : vector<8x32xf32> to vector<8xf32>
    %81 = arith.index_cast %c1_i32 : i32 to index
    %c0_24 = arith.constant 0 : index
    %82 = vector.load %arg3[%81, %c0_24] : memref<8x8xf32, #tpu.memory_space<vmem>>, vector<1x8xf32>
    %83 = vector.shape_cast %82 : vector<1x8xf32> to vector<8xf32>
    %84 = arith.mulf %80, %83 : vector<8xf32>
    %85 = arith.index_cast %c1_i32 : i32 to index
    %c0_25 = arith.constant 0 : index
    %86 = vector.load %arg7[%85, %c0_25] : memref<8x8xf32, #tpu.memory_space<vmem>>, vector<1x8xf32>
    %87 = vector.shape_cast %86 : vector<1x8xf32> to vector<8xf32>
    %88 = vector.shape_cast %84 : vector<8xf32> to vector<1x8xf32>
    tpu.vector_store %arg7[%85, %c0_25], %88 {strides = array<i32>} : memref<8x8xf32, #tpu.memory_space<vmem>>, vector<1x8xf32>,
    %c2_i32 = arith.constant 2 : i32
    %89 = arith.index_cast %c2_i32 : i32 to index
    %c0_26 = arith.constant 0 : index
    %c0_27 = arith.constant 0 : index
    %90 = vector.load %arg1[%89, %c0_26, %c0_27] : memref<8x8x128xf32, #tpu.memory_space<vmem>>, vector<1x8x128xf32>
    %91 = vector.shape_cast %90 : vector<1x8x128xf32> to vector<8x128xf32>
    %cst_28 = arith.constant dense<0.000000e+00> : vector<8x128xf32>
    %92 = tpu.matmul %77, %3, %cst_28 {dimension_numbers = #tpu.dot_dimension_numbers<[1], [0], [0], [1], [0, 0, 1, 1], [], []>} : vector<8x32xf32>, vector<32x128xf32>, vector<8x128xf32> -> vector<8x128xf32>
    %93 = arith.addf %91, %92 : vector<8x128xf32>
    %94 = vector.extract_strided_slice %93 {offsets = [0, 0], sizes = [8, 32], strides = [1, 1]} : vector<8x128xf32> to vector<8x32xf32>
    %95 = arith.negf %94 : vector<8x32xf32>
    %96 = math.exp %95 : vector<8x32xf32>
    %cst_29 = arith.constant 1.000000e+00 : f32
    %97 = vector.broadcast %cst_29 : f32 to vector<8x32xf32>
    %98 = arith.addf %97, %96 : vector<8x32xf32>
    %99 = arith.divf %97, %98 : vector<8x32xf32>
    %100 = vector.extract_strided_slice %93 {offsets = [0, 32], sizes = [8, 32], strides = [1, 1]} : vector<8x128xf32> to vector<8x32xf32>
    %101 = arith.negf %100 : vector<8x32xf32>
    %102 = math.exp %101 : vector<8x32xf32>
    %cst_30 = arith.constant 1.000000e+00 : f32
    %103 = vector.broadcast %cst_30 : f32 to vector<8x32xf32>
    %104 = arith.addf %103, %102 : vector<8x32xf32>
    %105 = arith.divf %103, %104 : vector<8x32xf32>
    %106 = vector.extract_strided_slice %93 {offsets = [0, 64], sizes = [8, 32], strides = [1, 1]} : vector<8x128xf32> to vector<8x32xf32>
    %107 = math.tanh %106 : vector<8x32xf32>
    %108 = vector.extract_strided_slice %93 {offsets = [0, 96], sizes = [8, 32], strides = [1, 1]} : vector<8x128xf32> to vector<8x32xf32>
    %109 = arith.negf %108 : vector<8x32xf32>
    %110 = math.exp %109 : vector<8x32xf32>
    %cst_31 = arith.constant 1.000000e+00 : f32
    %111 = vector.broadcast %cst_31 : f32 to vector<8x32xf32>
    %112 = arith.addf %111, %110 : vector<8x32xf32>
    %113 = arith.divf %111, %112 : vector<8x32xf32>
    %114 = arith.mulf %105, %75 : vector<8x32xf32>
    %115 = arith.mulf %99, %107 : vector<8x32xf32>
    %116 = arith.addf %114, %115 : vector<8x32xf32>
    %117 = math.tanh %116 : vector<8x32xf32>
    %118 = arith.mulf %113, %117 : vector<8x32xf32>
    %119 = vector.broadcast %4 : vector<1x32xf32> to vector<8x32xf32>
    %120 = arith.mulf %118, %119 : vector<8x32xf32>
    %cst_32 = arith.constant dense<0.000000e+00> : vector<8xf32>
    %121 = vector.multi_reduction <add>, %120, %cst_32 [1] : vector<8x32xf32> to vector<8xf32>
    %122 = arith.index_cast %c2_i32 : i32 to index
    %c0_33 = arith.constant 0 : index
    %123 = vector.load %arg3[%122, %c0_33] : memref<8x8xf32, #tpu.memory_space<vmem>>, vector<1x8xf32>
    %124 = vector.shape_cast %123 : vector<1x8xf32> to vector<8xf32>
    %125 = arith.mulf %121, %124 : vector<8xf32>
    %126 = arith.index_cast %c2_i32 : i32 to index
    %c0_34 = arith.constant 0 : index
    %127 = vector.load %arg7[%126, %c0_34] : memref<8x8xf32, #tpu.memory_space<vmem>>, vector<1x8xf32>
    %128 = vector.shape_cast %127 : vector<1x8xf32> to vector<8xf32>
    %129 = vector.shape_cast %125 : vector<8xf32> to vector<1x8xf32>
    tpu.vector_store %arg7[%126, %c0_34], %129 {strides = array<i32>} : memref<8x8xf32, #tpu.memory_space<vmem>>, vector<1x8xf32>,
    %c3_i32 = arith.constant 3 : i32
    %130 = arith.index_cast %c3_i32 : i32 to index
    %c0_35 = arith.constant 0 : index
    %c0_36 = arith.constant 0 : index
    %131 = vector.load %arg1[%130, %c0_35, %c0_36] : memref<8x8x128xf32, #tpu.memory_space<vmem>>, vector<1x8x128xf32>
    %132 = vector.shape_cast %131 : vector<1x8x128xf32> to vector<8x128xf32>
    %cst_37 = arith.constant dense<0.000000e+00> : vector<8x128xf32>
    %133 = tpu.matmul %118, %3, %cst_37 {dimension_numbers = #tpu.dot_dimension_numbers<[1], [0], [0], [1], [0, 0, 1, 1], [], []>} : vector<8x32xf32>, vector<32x128xf32>, vector<8x128xf32> -> vector<8x128xf32>
    %134 = arith.addf %132, %133 : vector<8x128xf32>
    %135 = vector.extract_strided_slice %134 {offsets = [0, 0], sizes = [8, 32], strides = [1, 1]} : vector<8x128xf32> to vector<8x32xf32>
    %136 = arith.negf %135 : vector<8x32xf32>
    %137 = math.exp %136 : vector<8x32xf32>
    %cst_38 = arith.constant 1.000000e+00 : f32
    %138 = vector.broadcast %cst_38 : f32 to vector<8x32xf32>
    %139 = arith.addf %138, %137 : vector<8x32xf32>
    %140 = arith.divf %138, %139 : vector<8x32xf32>
    %141 = vector.extract_strided_slice %134 {offsets = [0, 32], sizes = [8, 32], strides = [1, 1]} : vector<8x128xf32> to vector<8x32xf32>
    %142 = arith.negf %141 : vector<8x32xf32>
    %143 = math.exp %142 : vector<8x32xf32>
    %cst_39 = arith.constant 1.000000e+00 : f32
    %144 = vector.broadcast %cst_39 : f32 to vector<8x32xf32>
    %145 = arith.addf %144, %143 : vector<8x32xf32>
    %146 = arith.divf %144, %145 : vector<8x32xf32>
    %147 = vector.extract_strided_slice %134 {offsets = [0, 64], sizes = [8, 32], strides = [1, 1]} : vector<8x128xf32> to vector<8x32xf32>
    %148 = math.tanh %147 : vector<8x32xf32>
    %149 = vector.extract_strided_slice %134 {offsets = [0, 96], sizes = [8, 32], strides = [1, 1]} : vector<8x128xf32> to vector<8x32xf32>
    %150 = arith.negf %149 : vector<8x32xf32>
    %151 = math.exp %150 : vector<8x32xf32>
    %cst_40 = arith.constant 1.000000e+00 : f32
    %152 = vector.broadcast %cst_40 : f32 to vector<8x32xf32>
    %153 = arith.addf %152, %151 : vector<8x32xf32>
    %154 = arith.divf %152, %153 : vector<8x32xf32>
    %155 = arith.mulf %146, %116 : vector<8x32xf32>
    %156 = arith.mulf %140, %148 : vector<8x32xf32>
    %157 = arith.addf %155, %156 : vector<8x32xf32>
    %158 = math.tanh %157 : vector<8x32xf32>
    %159 = arith.mulf %154, %158 : vector<8x32xf32>
    %160 = vector.broadcast %4 : vector<1x32xf32> to vector<8x32xf32>
    %161 = arith.mulf %159, %160 : vector<8x32xf32>
    %cst_41 = arith.constant dense<0.000000e+00> : vector<8xf32>
    %162 = vector.multi_reduction <add>, %161, %cst_41 [1] : vector<8x32xf32> to vector<8xf32>
    %163 = arith.index_cast %c3_i32 : i32 to index
    %c0_42 = arith.constant 0 : index
    %164 = vector.load %arg3[%163, %c0_42] : memref<8x8xf32, #tpu.memory_space<vmem>>, vector<1x8xf32>
    %165 = vector.shape_cast %164 : vector<1x8xf32> to vector<8xf32>
    %166 = arith.mulf %162, %165 : vector<8xf32>
    %167 = arith.index_cast %c3_i32 : i32 to index
    %c0_43 = arith.constant 0 : index
    %168 = vector.load %arg7[%167, %c0_43] : memref<8x8xf32, #tpu.memory_space<vmem>>, vector<1x8xf32>
    %169 = vector.shape_cast %168 : vector<1x8xf32> to vector<8xf32>
    %170 = vector.shape_cast %166 : vector<8xf32> to vector<1x8xf32>
    tpu.vector_store %arg7[%167, %c0_43], %170 {strides = array<i32>} : memref<8x8xf32, #tpu.memory_space<vmem>>, vector<1x8xf32>,
    %c4_i32 = arith.constant 4 : i32
    %171 = arith.index_cast %c4_i32 : i32 to index
    %c0_44 = arith.constant 0 : index
    %c0_45 = arith.constant 0 : index
    %172 = vector.load %arg1[%171, %c0_44, %c0_45] : memref<8x8x128xf32, #tpu.memory_space<vmem>>, vector<1x8x128xf32>
    %173 = vector.shape_cast %172 : vector<1x8x128xf32> to vector<8x128xf32>
    %cst_46 = arith.constant dense<0.000000e+00> : vector<8x128xf32>
    %174 = tpu.matmul %159, %3, %cst_46 {dimension_numbers = #tpu.dot_dimension_numbers<[1], [0], [0], [1], [0, 0, 1, 1], [], []>} : vector<8x32xf32>, vector<32x128xf32>, vector<8x128xf32> -> vector<8x128xf32>
    %175 = arith.addf %173, %174 : vector<8x128xf32>
    %176 = vector.extract_strided_slice %175 {offsets = [0, 0], sizes = [8, 32], strides = [1, 1]} : vector<8x128xf32> to vector<8x32xf32>
    %177 = arith.negf %176 : vector<8x32xf32>
    %178 = math.exp %177 : vector<8x32xf32>
    %cst_47 = arith.constant 1.000000e+00 : f32
    %179 = vector.broadcast %cst_47 : f32 to vector<8x32xf32>
    %180 = arith.addf %179, %178 : vector<8x32xf32>
    %181 = arith.divf %179, %180 : vector<8x32xf32>
    %182 = vector.extract_strided_slice %175 {offsets = [0, 32], sizes = [8, 32], strides = [1, 1]} : vector<8x128xf32> to vector<8x32xf32>
    %183 = arith.negf %182 : vector<8x32xf32>
    %184 = math.exp %183 : vector<8x32xf32>
    %cst_48 = arith.constant 1.000000e+00 : f32
    %185 = vector.broadcast %cst_48 : f32 to vector<8x32xf32>
    %186 = arith.addf %185, %184 : vector<8x32xf32>
    %187 = arith.divf %185, %186 : vector<8x32xf32>
    %188 = vector.extract_strided_slice %175 {offsets = [0, 64], sizes = [8, 32], strides = [1, 1]} : vector<8x128xf32> to vector<8x32xf32>
    %189 = math.tanh %188 : vector<8x32xf32>
    %190 = vector.extract_strided_slice %175 {offsets = [0, 96], sizes = [8, 32], strides = [1, 1]} : vector<8x128xf32> to vector<8x32xf32>
    %191 = arith.negf %190 : vector<8x32xf32>
    %192 = math.exp %191 : vector<8x32xf32>
    %cst_49 = arith.constant 1.000000e+00 : f32
    %193 = vector.broadcast %cst_49 : f32 to vector<8x32xf32>
    %194 = arith.addf %193, %192 : vector<8x32xf32>
    %195 = arith.divf %193, %194 : vector<8x32xf32>
    %196 = arith.mulf %187, %157 : vector<8x32xf32>
    %197 = arith.mulf %181, %189 : vector<8x32xf32>
    %198 = arith.addf %196, %197 : vector<8x32xf32>
    %199 = math.tanh %198 : vector<8x32xf32>
    %200 = arith.mulf %195, %199 : vector<8x32xf32>
    %201 = vector.broadcast %4 : vector<1x32xf32> to vector<8x32xf32>
    %202 = arith.mulf %200, %201 : vector<8x32xf32>
    %cst_50 = arith.constant dense<0.000000e+00> : vector<8xf32>
    %203 = vector.multi_reduction <add>, %202, %cst_50 [1] : vector<8x32xf32> to vector<8xf32>
    %204 = arith.index_cast %c4_i32 : i32 to index
    %c0_51 = arith.constant 0 : index
    %205 = vector.load %arg3[%204, %c0_51] : memref<8x8xf32, #tpu.memory_space<vmem>>, vector<1x8xf32>
    %206 = vector.shape_cast %205 : vector<1x8xf32> to vector<8xf32>
    %207 = arith.mulf %203, %206 : vector<8xf32>
    %208 = arith.index_cast %c4_i32 : i32 to index
    %c0_52 = arith.constant 0 : index
    %209 = vector.load %arg7[%208, %c0_52] : memref<8x8xf32, #tpu.memory_space<vmem>>, vector<1x8xf32>
    %210 = vector.shape_cast %209 : vector<1x8xf32> to vector<8xf32>
    %211 = vector.shape_cast %207 : vector<8xf32> to vector<1x8xf32>
    tpu.vector_store %arg7[%208, %c0_52], %211 {strides = array<i32>} : memref<8x8xf32, #tpu.memory_space<vmem>>, vector<1x8xf32>,
    %c5_i32 = arith.constant 5 : i32
    %212 = arith.index_cast %c5_i32 : i32 to index
    %c0_53 = arith.constant 0 : index
    %c0_54 = arith.constant 0 : index
    %213 = vector.load %arg1[%212, %c0_53, %c0_54] : memref<8x8x128xf32, #tpu.memory_space<vmem>>, vector<1x8x128xf32>
    %214 = vector.shape_cast %213 : vector<1x8x128xf32> to vector<8x128xf32>
    %cst_55 = arith.constant dense<0.000000e+00> : vector<8x128xf32>
    %215 = tpu.matmul %200, %3, %cst_55 {dimension_numbers = #tpu.dot_dimension_numbers<[1], [0], [0], [1], [0, 0, 1, 1], [], []>} : vector<8x32xf32>, vector<32x128xf32>, vector<8x128xf32> -> vector<8x128xf32>
    %216 = arith.addf %214, %215 : vector<8x128xf32>
    %217 = vector.extract_strided_slice %216 {offsets = [0, 0], sizes = [8, 32], strides = [1, 1]} : vector<8x128xf32> to vector<8x32xf32>
    %218 = arith.negf %217 : vector<8x32xf32>
    %219 = math.exp %218 : vector<8x32xf32>
    %cst_56 = arith.constant 1.000000e+00 : f32
    %220 = vector.broadcast %cst_56 : f32 to vector<8x32xf32>
    %221 = arith.addf %220, %219 : vector<8x32xf32>
    %222 = arith.divf %220, %221 : vector<8x32xf32>
    %223 = vector.extract_strided_slice %216 {offsets = [0, 32], sizes = [8, 32], strides = [1, 1]} : vector<8x128xf32> to vector<8x32xf32>
    %224 = arith.negf %223 : vector<8x32xf32>
    %225 = math.exp %224 : vector<8x32xf32>
    %cst_57 = arith.constant 1.000000e+00 : f32
    %226 = vector.broadcast %cst_57 : f32 to vector<8x32xf32>
    %227 = arith.addf %226, %225 : vector<8x32xf32>
    %228 = arith.divf %226, %227 : vector<8x32xf32>
    %229 = vector.extract_strided_slice %216 {offsets = [0, 64], sizes = [8, 32], strides = [1, 1]} : vector<8x128xf32> to vector<8x32xf32>
    %230 = math.tanh %229 : vector<8x32xf32>
    %231 = vector.extract_strided_slice %216 {offsets = [0, 96], sizes = [8, 32], strides = [1, 1]} : vector<8x128xf32> to vector<8x32xf32>
    %232 = arith.negf %231 : vector<8x32xf32>
    %233 = math.exp %232 : vector<8x32xf32>
    %cst_58 = arith.constant 1.000000e+00 : f32
    %234 = vector.broadcast %cst_58 : f32 to vector<8x32xf32>
    %235 = arith.addf %234, %233 : vector<8x32xf32>
    %236 = arith.divf %234, %235 : vector<8x32xf32>
    %237 = arith.mulf %228, %198 : vector<8x32xf32>
    %238 = arith.mulf %222, %230 : vector<8x32xf32>
    %239 = arith.addf %237, %238 : vector<8x32xf32>
    %240 = math.tanh %239 : vector<8x32xf32>
    %241 = arith.mulf %236, %240 : vector<8x32xf32>
    %242 = vector.broadcast %4 : vector<1x32xf32> to vector<8x32xf32>
    %243 = arith.mulf %241, %242 : vector<8x32xf32>
    %cst_59 = arith.constant dense<0.000000e+00> : vector<8xf32>
    %244 = vector.multi_reduction <add>, %243, %cst_59 [1] : vector<8x32xf32> to vector<8xf32>
    %245 = arith.index_cast %c5_i32 : i32 to index
    %c0_60 = arith.constant 0 : index
    %246 = vector.load %arg3[%245, %c0_60] : memref<8x8xf32, #tpu.memory_space<vmem>>, vector<1x8xf32>
    %247 = vector.shape_cast %246 : vector<1x8xf32> to vector<8xf32>
    %248 = arith.mulf %244, %247 : vector<8xf32>
    %249 = arith.index_cast %c5_i32 : i32 to index
    %c0_61 = arith.constant 0 : index
    %250 = vector.load %arg7[%249, %c0_61] : memref<8x8xf32, #tpu.memory_space<vmem>>, vector<1x8xf32>
    %251 = vector.shape_cast %250 : vector<1x8xf32> to vector<8xf32>
    %252 = vector.shape_cast %248 : vector<8xf32> to vector<1x8xf32>
    tpu.vector_store %arg7[%249, %c0_61], %252 {strides = array<i32>} : memref<8x8xf32, #tpu.memory_space<vmem>>, vector<1x8xf32>,
    %c6_i32 = arith.constant 6 : i32
    %253 = arith.index_cast %c6_i32 : i32 to index
    %c0_62 = arith.constant 0 : index
    %c0_63 = arith.constant 0 : index
    %254 = vector.load %arg1[%253, %c0_62, %c0_63] : memref<8x8x128xf32, #tpu.memory_space<vmem>>, vector<1x8x128xf32>
    %255 = vector.shape_cast %254 : vector<1x8x128xf32> to vector<8x128xf32>
    %cst_64 = arith.constant dense<0.000000e+00> : vector<8x128xf32>
    %256 = tpu.matmul %241, %3, %cst_64 {dimension_numbers = #tpu.dot_dimension_numbers<[1], [0], [0], [1], [0, 0, 1, 1], [], []>} : vector<8x32xf32>, vector<32x128xf32>, vector<8x128xf32> -> vector<8x128xf32>
    %257 = arith.addf %255, %256 : vector<8x128xf32>
    %258 = vector.extract_strided_slice %257 {offsets = [0, 0], sizes = [8, 32], strides = [1, 1]} : vector<8x128xf32> to vector<8x32xf32>
    %259 = arith.negf %258 : vector<8x32xf32>
    %260 = math.exp %259 : vector<8x32xf32>
    %cst_65 = arith.constant 1.000000e+00 : f32
    %261 = vector.broadcast %cst_65 : f32 to vector<8x32xf32>
    %262 = arith.addf %261, %260 : vector<8x32xf32>
    %263 = arith.divf %261, %262 : vector<8x32xf32>
    %264 = vector.extract_strided_slice %257 {offsets = [0, 32], sizes = [8, 32], strides = [1, 1]} : vector<8x128xf32> to vector<8x32xf32>
    %265 = arith.negf %264 : vector<8x32xf32>
    %266 = math.exp %265 : vector<8x32xf32>
    %cst_66 = arith.constant 1.000000e+00 : f32
    %267 = vector.broadcast %cst_66 : f32 to vector<8x32xf32>
    %268 = arith.addf %267, %266 : vector<8x32xf32>
    %269 = arith.divf %267, %268 : vector<8x32xf32>
    %270 = vector.extract_strided_slice %257 {offsets = [0, 64], sizes = [8, 32], strides = [1, 1]} : vector<8x128xf32> to vector<8x32xf32>
    %271 = math.tanh %270 : vector<8x32xf32>
    %272 = vector.extract_strided_slice %257 {offsets = [0, 96], sizes = [8, 32], strides = [1, 1]} : vector<8x128xf32> to vector<8x32xf32>
    %273 = arith.negf %272 : vector<8x32xf32>
    %274 = math.exp %273 : vector<8x32xf32>
    %cst_67 = arith.constant 1.000000e+00 : f32
    %275 = vector.broadcast %cst_67 : f32 to vector<8x32xf32>
    %276 = arith.addf %275, %274 : vector<8x32xf32>
    %277 = arith.divf %275, %276 : vector<8x32xf32>
    %278 = arith.mulf %269, %239 : vector<8x32xf32>
    %279 = arith.mulf %263, %271 : vector<8x32xf32>
    %280 = arith.addf %278, %279 : vector<8x32xf32>
    %281 = math.tanh %280 : vector<8x32xf32>
    %282 = arith.mulf %277, %281 : vector<8x32xf32>
    %283 = vector.broadcast %4 : vector<1x32xf32> to vector<8x32xf32>
    %284 = arith.mulf %282, %283 : vector<8x32xf32>
    %cst_68 = arith.constant dense<0.000000e+00> : vector<8xf32>
    %285 = vector.multi_reduction <add>, %284, %cst_68 [1] : vector<8x32xf32> to vector<8xf32>
    %286 = arith.index_cast %c6_i32 : i32 to index
    %c0_69 = arith.constant 0 : index
    %287 = vector.load %arg3[%286, %c0_69] : memref<8x8xf32, #tpu.memory_space<vmem>>, vector<1x8xf32>
    %288 = vector.shape_cast %287 : vector<1x8xf32> to vector<8xf32>
    %289 = arith.mulf %285, %288 : vector<8xf32>
    %290 = arith.index_cast %c6_i32 : i32 to index
    %c0_70 = arith.constant 0 : index
    %291 = vector.load %arg7[%290, %c0_70] : memref<8x8xf32, #tpu.memory_space<vmem>>, vector<1x8xf32>
    %292 = vector.shape_cast %291 : vector<1x8xf32> to vector<8xf32>
    %293 = vector.shape_cast %289 : vector<8xf32> to vector<1x8xf32>
    tpu.vector_store %arg7[%290, %c0_70], %293 {strides = array<i32>} : memref<8x8xf32, #tpu.memory_space<vmem>>, vector<1x8xf32>,
    %c7_i32 = arith.constant 7 : i32
    %294 = arith.index_cast %c7_i32 : i32 to index
    %c0_71 = arith.constant 0 : index
    %c0_72 = arith.constant 0 : index
    %295 = vector.load %arg1[%294, %c0_71, %c0_72] : memref<8x8x128xf32, #tpu.memory_space<vmem>>, vector<1x8x128xf32>
    %296 = vector.shape_cast %295 : vector<1x8x128xf32> to vector<8x128xf32>
    %cst_73 = arith.constant dense<0.000000e+00> : vector<8x128xf32>
    %297 = tpu.matmul %282, %3, %cst_73 {dimension_numbers = #tpu.dot_dimension_numbers<[1], [0], [0], [1], [0, 0, 1, 1], [], []>} : vector<8x32xf32>, vector<32x128xf32>, vector<8x128xf32> -> vector<8x128xf32>
    %298 = arith.addf %296, %297 : vector<8x128xf32>
    %299 = vector.extract_strided_slice %298 {offsets = [0, 0], sizes = [8, 32], strides = [1, 1]} : vector<8x128xf32> to vector<8x32xf32>
    %300 = arith.negf %299 : vector<8x32xf32>
    %301 = math.exp %300 : vector<8x32xf32>
    %cst_74 = arith.constant 1.000000e+00 : f32
    %302 = vector.broadcast %cst_74 : f32 to vector<8x32xf32>
    %303 = arith.addf %302, %301 : vector<8x32xf32>
    %304 = arith.divf %302, %303 : vector<8x32xf32>
    %305 = vector.extract_strided_slice %298 {offsets = [0, 32], sizes = [8, 32], strides = [1, 1]} : vector<8x128xf32> to vector<8x32xf32>
    %306 = arith.negf %305 : vector<8x32xf32>
    %307 = math.exp %306 : vector<8x32xf32>
    %cst_75 = arith.constant 1.000000e+00 : f32
    %308 = vector.broadcast %cst_75 : f32 to vector<8x32xf32>
    %309 = arith.addf %308, %307 : vector<8x32xf32>
    %310 = arith.divf %308, %309 : vector<8x32xf32>
    %311 = vector.extract_strided_slice %298 {offsets = [0, 64], sizes = [8, 32], strides = [1, 1]} : vector<8x128xf32> to vector<8x32xf32>
    %312 = math.tanh %311 : vector<8x32xf32>
    %313 = vector.extract_strided_slice %298 {offsets = [0, 96], sizes = [8, 32], strides = [1, 1]} : vector<8x128xf32> to vector<8x32xf32>
    %314 = arith.negf %313 : vector<8x32xf32>
    %315 = math.exp %314 : vector<8x32xf32>
    %cst_76 = arith.constant 1.000000e+00 : f32
    %316 = vector.broadcast %cst_76 : f32 to vector<8x32xf32>
    %317 = arith.addf %316, %315 : vector<8x32xf32>
    %318 = arith.divf %316, %317 : vector<8x32xf32>
    %319 = arith.mulf %310, %280 : vector<8x32xf32>
    %320 = arith.mulf %304, %312 : vector<8x32xf32>
    %321 = arith.addf %319, %320 : vector<8x32xf32>
    %322 = math.tanh %321 : vector<8x32xf32>
    %323 = arith.mulf %318, %322 : vector<8x32xf32>
    %324 = vector.broadcast %4 : vector<1x32xf32> to vector<8x32xf32>
    %325 = arith.mulf %323, %324 : vector<8x32xf32>
    %cst_77 = arith.constant dense<0.000000e+00> : vector<8xf32>
    %326 = vector.multi_reduction <add>, %325, %cst_77 [1] : vector<8x32xf32> to vector<8xf32>
    %327 = arith.index_cast %c7_i32 : i32 to index
    %c0_78 = arith.constant 0 : index
    %328 = vector.load %arg3[%327, %c0_78] : memref<8x8xf32, #tpu.memory_space<vmem>>, vector<1x8xf32>
    %329 = vector.shape_cast %328 : vector<1x8xf32> to vector<8xf32>
    %330 = arith.mulf %326, %329 : vector<8xf32>
    %331 = arith.index_cast %c7_i32 : i32 to index
    %c0_79 = arith.constant 0 : index
    %332 = vector.load %arg7[%331, %c0_79] : memref<8x8xf32, #tpu.memory_space<vmem>>, vector<1x8xf32>
    %333 = vector.shape_cast %332 : vector<1x8xf32> to vector<8xf32>
    %334 = vector.shape_cast %330 : vector<8xf32> to vector<1x8xf32>
    tpu.vector_store %arg7[%331, %c0_79], %334 {strides = array<i32>} : memref<8x8xf32, #tpu.memory_space<vmem>>, vector<1x8xf32>,
    %c8_i32 = arith.constant 8 : i32
    %c0_80 = arith.constant 0 : index
    %c0_81 = arith.constant 0 : index
    %335 = vector.load %arg9[%c0_80, %c0_81] : memref<8x32xf32, #tpu.memory_space<vmem>>, vector<8x32xf32>
    tpu.vector_store %arg9[%c0_80, %c0_81], %323 {strides = array<i32>} : memref<8x32xf32, #tpu.memory_space<vmem>>, vector<8x32xf32>,
    %c0_82 = arith.constant 0 : index
    %c0_83 = arith.constant 0 : index
    %336 = vector.load %arg10[%c0_82, %c0_83] : memref<8x32xf32, #tpu.memory_space<vmem>>, vector<8x32xf32>
    tpu.vector_store %arg10[%c0_82, %c0_83], %321 {strides = array<i32>} : memref<8x32xf32, #tpu.memory_space<vmem>>, vector<8x32xf32>,
    %c0_84 = arith.constant 0 : index
    %c0_85 = arith.constant 0 : index
    %337 = vector.load %arg4[%c0_84, %c0_85] : memref<2x8xf32, #tpu.memory_space<vmem>>, vector<2x8xf32>
    %338 = vector.extract_strided_slice %337 {offsets = [0, 0], sizes = [1, 8], strides = [1, 1]} : vector<2x8xf32> to vector<1x8xf32>
    %339 = vector.extract_strided_slice %337 {offsets = [1, 0], sizes = [1, 8], strides = [1, 1]} : vector<2x8xf32> to vector<1x8xf32>
    %c0_86 = arith.constant 0 : index
    %c0_87 = arith.constant 0 : index
    %340 = vector.load %arg3[%c0_86, %c0_87] : memref<8x8xf32, #tpu.memory_space<vmem>>, vector<8x8xf32>
    %c0_88 = arith.constant 0 : index
    %c0_89 = arith.constant 0 : index
    %341 = vector.load %arg7[%c0_88, %c0_89] : memref<8x8xf32, #tpu.memory_space<vmem>>, vector<8x8xf32>
    %342 = vector.broadcast %338 : vector<1x8xf32> to vector<8x8xf32>
    %343 = arith.addf %341, %342 : vector<8x8xf32>
    %cst_90 = arith.constant 0.000000e+00 : f32
    %344 = vector.broadcast %cst_90 : f32 to vector<8x8xf32>
    %345 = arith.cmpf ogt, %343, %344 : vector<8x8xf32>
    %cst_91 = arith.constant 0.000000e+00 : f32
    %346 = vector.broadcast %cst_91 : f32 to vector<8x8xf32>
    %347 = arith.minimumf %343, %346 : vector<8x8xf32>
    %348 = math.exp %347 : vector<8x8xf32>
    %cst_92 = arith.constant 1.000000e+00 : f32
    %349 = vector.broadcast %cst_92 : f32 to vector<8x8xf32>
    %350 = arith.subf %348, %349 : vector<8x8xf32>
    %351 = arith.select %345, %343, %350 : vector<8x8xi1>, vector<8x8xf32>
    %c0_93 = arith.constant 0 : index
    %c0_94 = arith.constant 0 : index
    %352 = vector.load %arg2[%c0_93, %c0_94] : memref<8x8xf32, #tpu.memory_space<vmem>>, vector<8x8xf32>
    %353 = vector.broadcast %339 : vector<1x8xf32> to vector<8x8xf32>
    %354 = arith.mulf %353, %352 : vector<8x8xf32>
    %cst_95 = arith.constant 1.000000e+00 : f32
    %355 = vector.broadcast %cst_95 : f32 to vector<1x8xf32>
    %356 = arith.divf %355, %339 : vector<1x8xf32>
    %357 = arith.addf %351, %354 : vector<8x8xf32>
    %358 = math.exp %351 : vector<8x8xf32>
    %359 = arith.addf %351, %354 : vector<8x8xf32>
    %360 = math.exp %359 : vector<8x8xf32>
    %361 = arith.subf %358, %360 : vector<8x8xf32>
    %362 = vector.broadcast %356 : vector<1x8xf32> to vector<8x8xf32>
    %363 = arith.mulf %361, %362 : vector<8x8xf32>
    %364 = arith.addf %357, %363 : vector<8x8xf32>
    %c0_96 = arith.constant 0 : index
    %c0_97 = arith.constant 0 : index
    %365 = vector.load %arg7[%c0_96, %c0_97] : memref<8x8xf32, #tpu.memory_space<vmem>>, vector<8x8xf32>
    tpu.vector_store %arg7[%c0_96, %c0_97], %351 {strides = array<i32>} : memref<8x8xf32, #tpu.memory_space<vmem>>, vector<8x8xf32>,
    %c0_98 = arith.constant 0 : index
    %c0_99 = arith.constant 0 : index
    %366 = vector.load %arg8[%c0_98, %c0_99] : memref<1x1xf32, #tpu.memory_space<vmem>>, vector<1x1xf32>
    %367 = arith.mulf %364, %340 : vector<8x8xf32>
    %368 = vector.shape_cast %367 : vector<8x8xf32> to vector<1x8x8xf32>
    %cst_100 = arith.constant dense<0.000000e+00> : vector<1xf32>
    %369 = vector.multi_reduction <add>, %368, %cst_100 [1, 2] : vector<1x8x8xf32> to vector<1xf32>
    %370 = vector.shape_cast %369 : vector<1xf32> to vector<1x1x1xf32>
    %371 = vector.extract %370[0, 0, 0] : f32 from vector<1x1x1xf32>
    %372 = vector.broadcast %371 : f32 to vector<1x1xf32>
    %373 = arith.addf %366, %372 : vector<1x1xf32>
    %c0_101 = arith.constant 0 : index
    %c0_102 = arith.constant 0 : index
    %374 = vector.load %arg8[%c0_101, %c0_102] : memref<1x1xf32, #tpu.memory_space<vmem>>, vector<1x1xf32>
    tpu.vector_store %arg8[%c0_101, %c0_102], %373 {strides = array<i32>} : memref<1x1xf32, #tpu.memory_space<vmem>>, vector<1x1xf32>,
    return
  }
  func.func @transform_0(%arg0: i32) -> (i32, i32, i32) {
    %c0_i32 = arith.constant 0 : i32
    %c0_i32_0 = arith.constant 0 : i32
    %c0_i32_1 = arith.constant 0 : i32
    return %arg0, %c0_i32, %c0_i32_0 : i32, i32, i32
  }
  func.func @transform_1(%arg0: i32) -> (i32, i32) {
    %c0_i32 = arith.constant 0 : i32
    %c0_i32_0 = arith.constant 0 : i32
    return %arg0, %c0_i32 : i32, i32
  }
  func.func @transform_2(%arg0: i32) -> (i32, i32) {
    %c0_i32 = arith.constant 0 : i32
    %c0_i32_0 = arith.constant 0 : i32
    return %arg0, %c0_i32 : i32, i32
  }
  func.func @transform_3(%arg0: i32) -> (i32, i32) {
    %c0_i32 = arith.constant 0 : i32
    %c0_i32_0 = arith.constant 0 : i32
    %c0_i32_1 = arith.constant 0 : i32
    return %c0_i32, %c0_i32_0 : i32, i32
  }
  func.func @transform_4(%arg0: i32) -> (i32, i32) {
    %c0_i32 = arith.constant 0 : i32
    %c0_i32_0 = arith.constant 0 : i32
    %c0_i32_1 = arith.constant 0 : i32
    return %c0_i32, %c0_i32_0 : i32, i32
  }
  func.func @transform_5(%arg0: i32) -> (i32, i32) {
    %c0_i32 = arith.constant 0 : i32
    %c0_i32_0 = arith.constant 0 : i32
    %c0_i32_1 = arith.constant 0 : i32
    return %c0_i32, %c0_i32_0 : i32, i32
  }
  func.func @transform_6(%arg0: i32) -> (i32, i32) {
    %c0_i32 = arith.constant 0 : i32
    %c0_i32_0 = arith.constant 0 : i32
    return %arg0, %c0_i32 : i32, i32
  }
  func.func @transform_7(%arg0: i32) -> (i32, i32) {
    %c0_i32 = arith.constant 0 : i32
    %c0_i32_0 = arith.constant 0 : i32
    %c0_i32_1 = arith.constant 0 : i32
    return %c0_i32, %c0_i32_0 : i32, i32
  }
}

</mosaic_0001>

<bundles_post_ra>
// kernel: rmtpp_forward.1
= control target key start
LH: loop header
LB: loop body
LE: loop exit
PB: predicated region body
PF: predicated region fallthrough
CT: control target
= control target key end

     0   :  { %v1500_v3 = vmov 0.0|0.0   ;;  %vm1501_vm0 = vmmov 0   ;;  %v1502_v6 = vmov 0.0   ;;  %vm30_vm1 = vcmask 261120   ;;  %s1825_s0 = inlined_call_operand.vmem [shape: f32[8,8,128], index: 0, kind: input, shape index: {}]   ;;  %s1826_s1 = inlined_call_operand.vmem [shape: f32[8,8], index: 1, kind: input, shape index: {}]   ;;  %s1827_s2 = inlined_call_operand.vmem [shape: f32[8,8], index: 2, kind: input, shape index: {}]   ;;  %s1828_s3 = inlined_call_operand.vmem [shape: f32[2,8], index: 3, kind: input, shape index: {}]   ;;  %s1829_s4 = inlined_call_operand.vmem [shape: f32[32,128], index: 4, kind: input, shape index: {}]   ;;  %s1830_s5 = inlined_call_operand.vmem [shape: f32[1,32], index: 5, kind: input, shape index: {}]   ;;  %s1831_s6 = inlined_call_operand.vmem [shape: f32[8,8], index: 6, kind: output, shape index: {0}]   ;;  %s1832_s7 = inlined_call_operand.hbm [shape: f32[1,1], index: 7, kind: output, shape index: {1}]  }
   0x1   :  { %v35_v0 = vld [vmem:[%s1829_s4] sm:$0xff]  ;;  %v36_v1 = vld [vmem:[%s1829_s4 + $0x8] sm:$0xff]  ;;  %v37_v2 = vld [vmem:[%s1829_s4 + $0x10] sm:$0xff]  ;;  %1344 = vmatprep.subr.bf16.mxu0 %v1500_v3  ;;  %1264 = vmatprep.mubr.msk.f32.mxu0 %vm1501_vm0, %v1502_v6 }
   0x2   :  { %v1558_v4 = vpack.c.bf16 %v36_v1, %v35_v0  ;;  %v38_v5 = vld [vmem:[%s1829_s4 + $0x18] sm:$0xff] }
   0x3   :  { %13 = vsyncpa [#allocation5], 0  ;;  %31 = vst.msk [vmem:[#allocation2] sm:$0xff] %vm30_vm1, %v1502_v6  ;;  %1350 = vmatprep.subr.bf16.mxu1 %v1500_v3  ;;  %1275 = vmatprep.mubr.msk.f32.mxu1 %vm1501_vm0, %v1502_v6  ;;  %v1573_v7 = vpack.c.bf16 %v38_v5, %v37_v2  ;;  %v42_v9 = vld [vmem:[%s1825_s0] sm:$0xff]  ;;  %s1503_s10 = smov 64   ;;  %s1504_s11 = smov 32  }
   0x4   :  { %32 = vst.msk [vmem:[#allocation3] sm:$0xff] %vm30_vm1, %v1502_v6  ;;  %1346 = vmatpush3.bf16.msra.mxu0 %v1558_v4  ;;  %1352 = vmatpush3.bf16.msra.mxu1 %v1558_v4  ;;  %v1187_v29 = vld [vmem:[%s1825_s0 + $0x8] sm:$0xff]  ;;  %v1191_v47 = vld [vmem:[%s1825_s0 + $0x10] sm:$0xff]  ;;  %v1195_v1 = vld [vmem:[%s1825_s0 + $0x18] sm:$0xff]  ;;  %vm184_vm2 = vcmask 57344   ;;  %vm1147_vm3 = vcmask 64512  }
   0x5   :  { %1347 = vmatprep.subr.bf16.mxu0 %v1500_v3  ;;  %1353 = vmatprep.subr.bf16.mxu1 %v1500_v3  ;;  %vm33_vm5 = vcmask 0  }
   0x6   :  { %34 = vst.msk [vmem:[#allocation4] sm:$0x1] %vm33_vm5, %v1502_v6 }
   0x8   :  { %1349 = vmatpush3.bf16.msra.mxu0 %v1573_v7  ;;  %1355 = vmatpush3.bf16.msra.mxu1 %v1573_v7 }
   0x9   :  { %1356 = vmatprep.subr.bf16.mxu0 %v1500_v3  ;;  %1362 = vmatprep.subr.bf16.mxu1 %v1500_v3 }
   0xa   :  { %v40_v8 = vld [vmem:[#allocation2] sm:$0xff] }
   0xb   :  { %1265 = vmatmul.mubr.msk.f32.vlgmr.msra.gmra.mrb[0].mxu0 %vm30_vm1, %v40_v8  ;;  %v41_v14 = vld [vmem:[#allocation3] sm:$0xff] }
   0xc   :  { %1358 = vmatpush3.bf16.msra.mxu0 %v1558_v4  ;;  %1286 = vmatprep.mubr.msk.f32.mxu0 %vm1501_vm0, %v1502_v6 }
   0xd   :  { %1359 = vmatprep.subr.bf16.mxu0 %v1500_v3 }
  0x10   :  { %1361 = vmatpush3.bf16.msra.mxu0 %v1573_v7 }
  0x11   :  { %1368 = vmatprep.subr.bf16.mxu0 %v1500_v3 }
  0xde   :  { %v113_v10 = vpop.f32.mrb[0].mxu0 }
  0xdf   :  { %v117_v11 = vadd.f32 %v113_v10, %v42_v9  ;;  %v1266_v12 = vpop.f32.mrb[1].mxu0 }
  0xe1   :  { %1404 = vtanh.f32 %v117_v11  ;;  %v1184_v15 = vmul.f32 -1.442695, %v117_v11 }
  0xe3   :  { %1406 = vpow2.f32 %v1184_v15 }
  0xeb   :  { %v1405_v13 = vpop.eup %1404 }
  0xec   :  { %131 = vrot.lane.b32.xlu0 %v1405_v13, %s1503_s10 }
  0xed   :  { %v1407_v16 = vpop.eup %1406 }
  0xee   :  { %v121_v17 = vadd.f32 1.0, %v1407_v16 }
  0xf0   :  { %126 = vrot.lane.b32.xlu0 %v41_v14, %s1504_s11  ;;  %1408 = vrcp.f32 %v121_v17 }
  0xfa   :  { %v1409_v18 = vpop.eup %1408 }
 0x15e   :  { %v132_v19 = vpop.permute.xlu0 %131 }
 0x15f   :  { %v134_v20 = vmul.f32 %v1409_v18, %v132_v19 }
 0x161   :  { %136 = vrot.lane.b32.xlu1 %v134_v20, %s1504_s11 }
 0x162   :  { %v127_v21 = vpop.permute.xlu0 %126 }
 0x163   :  { %v129_v22 = vmul.f32 %v1409_v18, %v127_v21 }
 0x1d3   :  { %v137_v23 = vpop.permute.xlu1 %136 }
 0x1d4   :  { %v139_v24 = vadd.f32 %v137_v23, %v129_v22  ;;  %v1199_v23 = vld [vmem:[%s1825_s0 + $0x20] sm:$0xff] }
 0x1d6   :  { %1410 = vtanh.f32 %v139_v24 }
 0x1e0   :  { %v1411_v25 = vpop.eup %1410 }
 0x1e1   :  { %142 = vrot.lane.b32.xlu1 %v1411_v25, %s1503_s10 }
 0x253   :  { %v143_v26 = vpop.permute.xlu1 %142 }
 0x254   :  { %v1596_v27 = vmul.f32 %v1409_v18, %v143_v26 }
 0x256   :  { %189 = vrot.lane.b32.xlu0 %v1596_v27, %s1504_s11 }
 0x2c8   :  { %v190_v28 = vpop.permute.xlu0 %189 }
 0x2c9   :  { %1276 = vmatmul.mubr.msk.f32.vlgmr.msra.gmra.mrb[0].mxu1 %vm30_vm1, %v190_v28 }
 0x2ca   :  { %1364 = vmatpush3.bf16.msra.mxu1 %v1558_v4  ;;  %1297 = vmatprep.mubr.msk.f32.mxu1 %vm1501_vm0, %v1502_v6 }
 0x2cb   :  { %1365 = vmatprep.subr.bf16.mxu1 %v1500_v3 }
 0x2ce   :  { %1367 = vmatpush3.bf16.msra.mxu1 %v1573_v7 }
 0x2cf   :  { %1374 = vmatprep.subr.bf16.mxu1 %v1500_v3 }
 0x39c   :  { %v259_v30 = vpop.f32.mrb[0].mxu1 }
 0x39d   :  { %v263_v31 = vadd.f32 %v1187_v29, %v259_v30  ;;  %v1277_v32 = vpop.f32.mrb[1].mxu1 }
 0x39f   :  { %1412 = vtanh.f32 %v263_v31  ;;  %v1189_v34 = vmul.f32 -1.442695, %v263_v31 }
 0x3a1   :  { %1414 = vpow2.f32 %v1189_v34 }
 0x3a9   :  { %v1413_v33 = vpop.eup %1412 }
 0x3aa   :  { %273 = vrot.lane.b32.xlu1 %v1413_v33, %s1503_s10 }
 0x3ab   :  { %v1415_v35 = vpop.eup %1414 }
 0x3ac   :  { %v267_v36 = vadd.f32 1.0, %v1415_v35 }
 0x3ae   :  { %1416 = vrcp.f32 %v267_v36 }
 0x3b8   :  { %v1417_v37 = vpop.eup %1416 }
 0x3b9   :  { %v271_v40 = vmul.f32 %v1417_v37, %v139_v24 }
 0x41c   :  { %v274_v38 = vpop.permute.xlu1 %273 }
 0x41d   :  { %v276_v39 = vmul.f32 %v1417_v37, %v274_v38 }
 0x41f   :  { %278 = vrot.lane.b32.xlu0 %v276_v39, %s1504_s11 }
 0x491   :  { %v279_v41 = vpop.permute.xlu0 %278 }
 0x492   :  { %v281_v42 = vadd.f32 %v279_v41, %v271_v40 }
 0x494   :  { %1418 = vtanh.f32 %v281_v42 }
 0x49e   :  { %v1419_v43 = vpop.eup %1418 }
 0x49f   :  { %284 = vrot.lane.b32.xlu1 %v1419_v43, %s1503_s10 }
 0x511   :  { %v285_v44 = vpop.permute.xlu1 %284 }
 0x512   :  { %v1613_v45 = vmul.f32 %v1417_v37, %v285_v44 }
 0x514   :  { %320 = vrot.lane.b32.xlu0 %v1613_v45, %s1504_s11 }
 0x586   :  { %v321_v46 = vpop.permute.xlu0 %320 }
 0x587   :  { %1287 = vmatmul.mubr.msk.f32.vlgmr.msra.gmra.mrb[2].mxu0 %vm30_vm1, %v321_v46 }
 0x588   :  { %1370 = vmatpush3.bf16.msra.mxu0 %v1558_v4  ;;  %1308 = vmatprep.mubr.msk.f32.mxu0 %vm1501_vm0, %v1502_v6 }
 0x589   :  { %1371 = vmatprep.subr.bf16.mxu0 %v1500_v3 }
 0x58c   :  { %1373 = vmatpush3.bf16.msra.mxu0 %v1573_v7 }
 0x58d   :  { %1380 = vmatprep.subr.bf16.mxu0 %v1500_v3 }
 0x65a   :  { %v390_v48 = vpop.f32.mrb[2].mxu0 }
 0x65b   :  { %v394_v49 = vadd.f32 %v1191_v47, %v390_v48  ;;  %v1288_v50 = vpop.f32.mrb[3].mxu0 }
 0x65d   :  { %1420 = vtanh.f32 %v394_v49  ;;  %v1193_v52 = vmul.f32 -1.442695, %v394_v49 }
 0x65f   :  { %1422 = vpow2.f32 %v1193_v52 }
 0x667   :  { %v1421_v51 = vpop.eup %1420 }
 0x668   :  { %404 = vrot.lane.b32.xlu1 %v1421_v51, %s1503_s10 }
 0x669   :  { %v1423_v53 = vpop.eup %1422 }
 0x66a   :  { %v398_v54 = vadd.f32 1.0, %v1423_v53 }
 0x66c   :  { %1424 = vrcp.f32 %v398_v54 }
 0x676   :  { %v1425_v55 = vpop.eup %1424 }
 0x677   :  { %v402_v58 = vmul.f32 %v1425_v55, %v281_v42  ;;  %v1203_v42 = vld [vmem:[%s1825_s0 + $0x28] sm:$0xff] }
 0x6da   :  { %v405_v56 = vpop.permute.xlu1 %404 }
 0x6db   :  { %v407_v57 = vmul.f32 %v1425_v55, %v405_v56 }
 0x6dd   :  { %409 = vrot.lane.b32.xlu0 %v407_v57, %s1504_s11 }
 0x74f   :  { %v410_v59 = vpop.permute.xlu0 %409 }
 0x750   :  { %v412_v60 = vadd.f32 %v410_v59, %v402_v58  ;;  %v1207_v58 = vld [vmem:[%s1825_s0 + $0x30] sm:$0xff] }
 0x752   :  { %1426 = vtanh.f32 %v412_v60 }
 0x75c   :  { %v1427_v61 = vpop.eup %1426 }
 0x75d   :  { %415 = vrot.lane.b32.xlu1 %v1427_v61, %s1503_s10 }
 0x7cf   :  { %v416_v62 = vpop.permute.xlu1 %415 }
 0x7d0   :  { %v1630_v63 = vmul.f32 %v1425_v55, %v416_v62 }
 0x7d2   :  { %451 = vrot.lane.b32.xlu0 %v1630_v63, %s1504_s11 }
 0x844   :  { %v452_v0 = vpop.permute.xlu0 %451 }
 0x845   :  { %1298 = vmatmul.mubr.msk.f32.vlgmr.msra.gmra.mrb[2].mxu1 %vm30_vm1, %v452_v0 }
 0x846   :  { %1376 = vmatpush3.bf16.msra.mxu1 %v1558_v4  ;;  %1319 = vmatprep.mubr.msk.f32.mxu1 %vm1501_vm0, %v1502_v6 }
 0x847   :  { %1377 = vmatprep.subr.bf16.mxu1 %v1500_v3 }
 0x84a   :  { %1379 = vmatpush3.bf16.msra.mxu1 %v1573_v7 }
 0x84b   :  { %1386 = vmatprep.subr.bf16.mxu1 %v1500_v3 }
 0x918   :  { %v521_v2 = vpop.f32.mrb[2].mxu1 }
 0x919   :  { %v525_v5 = vadd.f32 %v1195_v1, %v521_v2  ;;  %v1299_v8 = vpop.f32.mrb[3].mxu1 }
 0x91b   :  { %1428 = vtanh.f32 %v525_v5  ;;  %v1197_v10 = vmul.f32 -1.442695, %v525_v5 }
 0x91d   :  { %1430 = vpow2.f32 %v1197_v10 }
 0x925   :  { %v1429_v9 = vpop.eup %1428 }
 0x926   :  { %535 = vrot.lane.b32.xlu1 %v1429_v9, %s1503_s10 }
 0x927   :  { %v1431_v11 = vpop.eup %1430 }
 0x928   :  { %v529_v12 = vadd.f32 1.0, %v1431_v11 }
 0x92a   :  { %1432 = vrcp.f32 %v529_v12 }
 0x934   :  { %v1433_v13 = vpop.eup %1432 }
 0x935   :  { %v533_v16 = vmul.f32 %v1433_v13, %v412_v60 }
 0x998   :  { %v536_v14 = vpop.permute.xlu1 %535 }
 0x999   :  { %v538_v15 = vmul.f32 %v1433_v13, %v536_v14 }
 0x99b   :  { %540 = vrot.lane.b32.xlu0 %v538_v15, %s1504_s11 }
 0xa0d   :  { %v541_v17 = vpop.permute.xlu0 %540 }
 0xa0e   :  { %v543_v18 = vadd.f32 %v541_v17, %v533_v16  ;;  %v1211_v17 = vld [vmem:[%s1825_s0 + $0x38] sm:$0xff]  ;;  %s1505_s0 = smov 96  }
 0xa10   :  { %1434 = vtanh.f32 %v543_v18 }
 0xa1a   :  { %v1435_v19 = vpop.eup %1434 }
 0xa1b   :  { %546 = vrot.lane.b32.xlu1 %v1435_v19, %s1503_s10 }
 0xa8d   :  { %v547_v20 = vpop.permute.xlu1 %546 }
 0xa8e   :  { %v1647_v21 = vmul.f32 %v1433_v13, %v547_v20 }
 0xa90   :  { %582 = vrot.lane.b32.xlu0 %v1647_v21, %s1504_s11 }
 0xb02   :  { %v583_v22 = vpop.permute.xlu0 %582 }
 0xb03   :  { %1309 = vmatmul.mubr.msk.f32.vlgmr.msra.gmra.mrb[4].mxu0 %vm30_vm1, %v583_v22 }
 0xb04   :  { %1382 = vmatpush3.bf16.msra.mxu0 %v1558_v4  ;;  %1330 = vmatprep.mubr.msk.f32.mxu0 %vm1501_vm0, %v1502_v6 }
 0xb05   :  { %1383 = vmatprep.subr.bf16.mxu0 %v1500_v3 }
 0xb08   :  { %1385 = vmatpush3.bf16.msra.mxu0 %v1573_v7 }
 0xbd6   :  { %v652_v24 = vpop.f32.mrb[4].mxu0 }
 0xbd7   :  { %v656_v25 = vadd.f32 %v1199_v23, %v652_v24  ;;  %v1310_v26 = vpop.f32.mrb[5].mxu0 }
 0xbd9   :  { %1436 = vtanh.f32 %v656_v25  ;;  %v1201_v29 = vmul.f32 -1.442695, %v656_v25 }
 0xbdb   :  { %1438 = vpow2.f32 %v1201_v29 }
 0xbe3   :  { %v1437_v28 = vpop.eup %1436 }
 0xbe4   :  { %666 = vrot.lane.b32.xlu1 %v1437_v28, %s1503_s10 }
 0xbe5   :  { %v1439_v30 = vpop.eup %1438 }
 0xbe6   :  { %v660_v31 = vadd.f32 1.0, %v1439_v30  ;;  %v1185_v30 = vld [vmem:[%s1830_s5] ss:$0 sm:$0xff] }
 0xbe8   :  { %1440 = vrcp.f32 %v660_v31 }
 0xbf2   :  { %v1441_v32 = vpop.eup %1440 }
 0xbf3   :  { %v664_v35 = vmul.f32 %v1441_v32, %v543_v18 }
 0xc56   :  { %v667_v33 = vpop.permute.xlu1 %666 }
 0xc57   :  { %v669_v34 = vmul.f32 %v1441_v32, %v667_v33 }
 0xc59   :  { %671 = vrot.lane.b32.xlu0 %v669_v34, %s1504_s11 }
 0xccb   :  { %v672_v36 = vpop.permute.xlu0 %671 }
 0xccc   :  { %v674_v37 = vadd.f32 %v672_v36, %v664_v35 }
 0xcce   :  { %1442 = vtanh.f32 %v674_v37 }
 0xcd8   :  { %v1443_v38 = vpop.eup %1442 }
 0xcd9   :  { %677 = vrot.lane.b32.xlu1 %v1443_v38, %s1503_s10 }
 0xd4b   :  { %v678_v39 = vpop.permute.xlu1 %677 }
 0xd4c   :  { %v1663_v40 = vmul.f32 %v1441_v32, %v678_v39 }
 0xd4e   :  { %713 = vrot.lane.b32.xlu0 %v1663_v40, %s1504_s11 }
 0xdc0   :  { %v714_v41 = vpop.permute.xlu0 %713 }
 0xdc1   :  { %1320 = vmatmul.mubr.msk.f32.vlgmr.msra.gmra.mrb[4].mxu1 %vm30_vm1, %v714_v41 }
 0xdc2   :  { %1388 = vmatpush3.bf16.msra.mxu1 %v1558_v4  ;;  %1341 = vmatprep.mubr.msk.f32.mxu1 %vm1501_vm0, %v1502_v6 }
 0xdc3   :  { %1389 = vmatprep.subr.bf16.mxu1 %v1500_v3 }
 0xdc6   :  { %1391 = vmatpush3.bf16.msra.mxu1 %v1573_v7 }
 0xe94   :  { %v783_v43 = vpop.f32.mrb[4].mxu1 }
 0xe95   :  { %v787_v44 = vadd.f32 %v1203_v42, %v783_v43  ;;  %v1321_v46 = vpop.f32.mrb[5].mxu1 }
 0xe97   :  { %1444 = vtanh.f32 %v787_v44  ;;  %v1205_v48 = vmul.f32 -1.442695, %v787_v44 }
 0xe99   :  { %1446 = vpow2.f32 %v1205_v48 }
 0xea1   :  { %v1445_v47 = vpop.eup %1444 }
 0xea2   :  { %797 = vrot.lane.b32.xlu1 %v1445_v47, %s1503_s10 }
 0xea3   :  { %v1447_v4 = vpop.eup %1446 }
 0xea4   :  { %v791_v49 = vadd.f32 1.0, %v1447_v4 }
 0xea6   :  { %1448 = vrcp.f32 %v791_v49 }
 0xeb0   :  { %v1449_v50 = vpop.eup %1448 }
 0xeb1   :  { %v795_v7 = vmul.f32 %v1449_v50, %v674_v37 }
 0xf14   :  { %v798_v3 = vpop.permute.xlu1 %797 }
 0xf15   :  { %v800_v51 = vmul.f32 %v1449_v50, %v798_v3  ;;  %v1194_v3 = vld [vmem:[%s1827_s2 + $0x2] ss:$0 sm:$0xff] }
 0xf17   :  { %802 = vrot.lane.b32.xlu0 %v800_v51, %s1504_s11  ;;  %v1506_v51 = vmov 0  }
 0xf18   :  { %1403 = vset.pattern.permute.xlu0 %v1506_v51  ;;  %1402 = vset.pattern.permute.xlu1 %v1506_v51 }
 0xf89   :  { %v803_v52 = vpop.permute.xlu0 %802 }
 0xf8a   :  { %v805_v53 = vadd.f32 %v803_v52, %v795_v7  ;;  %v1202_v7 = vld [vmem:[%s1827_s2 + $0x4] ss:$0 sm:$0xff] }
 0xf8c   :  { %1450 = vtanh.f32 %v805_v53 }
 0xf96   :  { %v1451_v54 = vpop.eup %1450 }
 0xf97   :  { %808 = vrot.lane.b32.xlu1 %v1451_v54, %s1503_s10 }
0x1009   :  { %v809_v55 = vpop.permute.xlu1 %808 }
0x100a   :  { %v811_v56 = vmul.f32 %v1449_v50, %v809_v55  ;;  %v1190_v50 = vld [vmem:[%s1827_s2 + $0x1] ss:$0 sm:$0xff] }
0x100c   :  { %844 = vrot.lane.b32.xlu0 %v811_v56, %s1504_s11 }
0x107e   :  { %v845_v57 = vpop.permute.xlu0 %844 }
0x107f   :  { %1331 = vmatmul.mubr.msk.f32.vlgmr.msra.gmra.mrb[6].mxu0 %vm30_vm1, %v845_v57 }
0x1152   :  { %v914_v59 = vpop.f32.mrb[6].mxu0 }
0x1153   :  { %v918_v60 = vadd.f32 %v1207_v58, %v914_v59  ;;  %v1332_v61 = vpop.f32.mrb[7].mxu0  ;;  %v1186_v58 = vld [vmem:[%s1827_s2] ss:$0 sm:$0xff]  ;;  %v1198_v59 = vld [vmem:[%s1827_s2 + $0x3] ss:$0 sm:$0xff] }
0x1154   :  { %v1214_v61 = vld [vmem:[%s1827_s2 + $0x7] ss:$0 sm:$0xff] }
0x1155   :  { %1452 = vtanh.f32 %v918_v60  ;;  %v1209_v0 = vmul.f32 -1.442695, %v918_v60  ;;  %v1206_v60 = vld [vmem:[%s1827_s2 + $0x5] ss:$0 sm:$0xff] }
0x1157   :  { %1454 = vpow2.f32 %v1209_v0 }
0x115f   :  { %v1453_v62 = vpop.eup %1452 }
0x1160   :  { %928 = vrot.lane.b32.xlu1 %v1453_v62, %s1503_s10 }
0x1161   :  { %v1455_v1 = vpop.eup %1454 }
0x1162   :  { %v922_v2 = vadd.f32 1.0, %v1455_v1 }
0x1164   :  { %1456 = vrcp.f32 %v922_v2 }
0x116e   :  { %v1457_v5 = vpop.eup %1456 }
0x116f   :  { %v926_v10 = vmul.f32 %v1457_v5, %v805_v53 }
0x11d2   :  { %v929_v8 = vpop.permute.xlu1 %928 }
0x11d3   :  { %v931_v9 = vmul.f32 %v1457_v5, %v929_v8 }
0x11d5   :  { %933 = vrot.lane.b32.xlu0 %v931_v9, %s1504_s11  ;;  %v1210_v9 = vld [vmem:[%s1827_s2 + $0x6] ss:$0 sm:$0xff] }
0x1247   :  { %v934_v11 = vpop.permute.xlu0 %933 }
0x1248   :  { %v936_v12 = vadd.f32 %v934_v11, %v926_v10 }
0x124a   :  { %1458 = vtanh.f32 %v936_v12 }
0x1254   :  { %v1459_v13 = vpop.eup %1458 }
0x1255   :  { %939 = vrot.lane.b32.xlu1 %v1459_v13, %s1503_s10 }
0x12c7   :  { %v940_v14 = vpop.permute.xlu1 %939 }
0x12c8   :  { %v942_v15 = vmul.f32 %v1457_v5, %v940_v14 }
0x12ca   :  { %975 = vrot.lane.b32.xlu0 %v942_v15, %s1504_s11 }
0x133c   :  { %v976_v16 = vpop.permute.xlu0 %975 }
0x133d   :  { %1342 = vmatmul.mubr.msk.f32.vlgmr.msra.gmra.mrb[6].mxu1 %vm30_vm1, %v976_v16 }
0x1410   :  { %v1045_v18 = vpop.f32.mrb[6].mxu1 }
0x1411   :  { %v1049_v19 = vadd.f32 %v1211_v17, %v1045_v18  ;;  %v1343_v20 = vpop.f32.mrb[7].mxu1 }
0x1413   :  { %1460 = vtanh.f32 %v1049_v19  ;;  %v1213_v23 = vmul.f32 -1.442695, %v1049_v19 }
0x1415   :  { %1462 = vpow2.f32 %v1213_v23 }
0x141d   :  { %v1461_v22 = vpop.eup %1460 }
0x141e   :  { %1059 = vrot.lane.b32.xlu1 %v1461_v22, %s1503_s10 }
0x141f   :  { %v1463_v24 = vpop.eup %1462 }
0x1420   :  { %v1053_v25 = vadd.f32 1.0, %v1463_v24 }
0x1422   :  { %1464 = vrcp.f32 %v1053_v25 }
0x142c   :  { %v1465_v26 = vpop.eup %1464 }
0x142d   :  { %v1057_v31 = vmul.f32 %v1465_v26, %v936_v12 }
0x1490   :  { %v1060_v28 = vpop.permute.xlu1 %1059 }
0x1491   :  { %v1062_v29 = vmul.f32 %v1465_v26, %v1060_v28 }
0x1493   :  { %1064 = vrot.lane.b32.xlu0 %v1062_v29, %s1504_s11 }
0x1497   :  { %151 = vrot.lane.b32.xlu0 %v1185_v30, %s1505_s0 }
0x1505   :  { %v1065_v32 = vpop.permute.xlu0 %1064 }
0x1506   :  { %v1698_v33 = vadd.f32 %v1065_v32, %v1057_v31 }
0x1508   :  { %1466 = vtanh.f32 %v1698_v33 }
0x1509   :  { %v152_v34 = vpop.permute.xlu0 %151 }
0x150a   :  { %v288_v35 = vmul.f32 %v1613_v45, %v152_v34  ;;  %v550_v36 = vmul.f32 %v1647_v21, %v152_v34  ;;  %v812_v38 = vmul.f32 %v811_v56, %v152_v34  ;;  %v154_v39 = vmul.f32 %v152_v34, %v1596_v27 }
0x150b   :  { %v419_v41 = vmul.f32 %v1630_v63, %v152_v34  ;;  %v681_v45 = vmul.f32 %v1663_v40, %v152_v34  ;;  %v943_v21 = vmul.f32 %v942_v15, %v152_v34 }
0x150c   :  { %290 = vrot.lane.b32.xlu0 %v288_v35, %s1504_s11 }
0x1510   :  { %552 = vrot.lane.b32.xlu0 %v550_v36, %s1504_s11 }
0x1512   :  { %v1467_v37 = vpop.eup %1466 }
0x1513   :  { %1070 = vrot.lane.b32.xlu1 %v1467_v37, %s1503_s10 }
0x1514   :  { %814 = vrot.lane.b32.xlu0 %v812_v38, %s1504_s11 }
0x1517   :  { %156 = vrot.lane.b32.xlu1 %v154_v39, %s1504_s11 }
0x151b   :  { %421 = vrot.lane.b32.xlu1 %v419_v41, %s1504_s11 }
0x151f   :  { %683 = vrot.lane.b32.xlu1 %v681_v45, %s1504_s11 }
0x1523   :  { %945 = vrot.lane.b32.xlu1 %v943_v21, %s1504_s11 }
0x157e   :  { %v291_v42 = vpop.permute.xlu0 %290 }
0x157f   :  { %v293_v43 = vsel %vm30_vm1, %v291_v42, 0.0 }
0x1580   :  { %294 = vadd.xlane.f32.xlu0 %v293_v43 }
0x1582   :  { %v553_v46 = vpop.permute.xlu0 %552 }
0x1583   :  { %v555_v63 = vsel %vm30_vm1, %v553_v46, 0.0 }
0x1585   :  { %v1071_v44 = vpop.permute.xlu1 %1070 }
0x1586   :  { %v815_v48 = vpop.permute.xlu0 %814  ;;  %v1717_v40 = vmul.f32 %v1465_v26, %v1071_v44  ;;  %v177_v26 = vlaneseq }
0x1587   :  { %v817_v4 = vsel %vm30_vm1, %v815_v48, 0.0 }
0x1588   :  { %v1074_v49 = vmul.f32 %v1717_v40, %v152_v34  ;;  %v178_v29 = vand.u32 127, %v177_v26  ;;  %v1750_v30 = vshrl.u32 %v177_v26, 7 }
0x1589   :  { %v157_v27 = vpop.permute.xlu1 %156 }
0x158a   :  { %v159_v47 = vsel %vm30_vm1, %v157_v27, 0.0  ;;  %v181_v34 = vsub.s32 %v178_v29, %v1750_v30 }
0x158b   :  { %160 = vadd.xlane.f32.xlu1 %v159_v47 }
0x158d   :  { %v422_v52 = vpop.permute.xlu1 %421 }
0x158e   :  { %v424_v54 = vsel %vm30_vm1, %v422_v52, 0.0 }
0x158f   :  { %556 = vadd.xlane.f32.xlu1 %v555_v63 }
0x1591   :  { %v684_v53 = vpop.permute.xlu1 %683 }
0x1592   :  { %v686_v55 = vsel %vm30_vm1, %v684_v53, 0.0 }
0x1593   :  { %818 = vadd.xlane.f32.xlu1 %v817_v4 }
0x1595   :  { %v946_v56 = vpop.permute.xlu1 %945 }
0x1596   :  { %1076 = vrot.lane.b32.xlu0 %v1074_v49, %s1504_s11  ;;  %v948_v57 = vsel %vm30_vm1, %v946_v56, 0.0  ;;  %v1118_v49 = vsub.s32 0, %v1750_v30 }
0x15a4   :  { %303 = vbcast.lane.b32.xlu1 %v1190_v50, 256 }
0x15a8   :  { %434 = vbcast.lane.b32.xlu1 %v1194_v3, 256  ;;  %v1113_v3 = vld [vmem:[%s1828_s3] sm:$0x3] }
0x15a9   :  { %v1119_v51 = vrot.slane %v1113_v3, %v1118_v49 }
0x15ac   :  { %696 = vbcast.lane.b32.xlu1 %v1202_v7, 256 }
0x15b5   :  { %425 = vadd.xlane.f32.xlu0 %v424_v54 }
0x15b9   :  { %687 = vadd.xlane.f32.xlu0 %v686_v55  ;;  %v1130_v55 = vsub.s32 1, %v1750_v30 }
0x15bb   :  { %v1131_v56 = vrot.slane %v1113_v3, %v1130_v55 }
0x15bd   :  { %949 = vadd.xlane.f32.xlu0 %v948_v57  ;;  %v1127_v57 = vld [vmem:[%s1826_s1] sm:$0xff] }
0x15d3   :  { %169 = vbcast.lane.b32.xlu0 %v1186_v58, 256 }
0x15d7   :  { %565 = vbcast.lane.b32.xlu0 %v1198_v59, 256  ;;  %v1132_v59 = vmul.f32 %v1131_v56, %v1127_v57 }
0x15db   :  { %827 = vbcast.lane.b32.xlu0 %v1206_v60, 256 }
0x15df   :  { %1089 = vbcast.lane.b32.xlu0 %v1214_v61, 256 }
0x160d   :  { %v295_v62 = vpop.xlane.xlu0 %294 }
0x1611   :  { %v1077_v0 = vpop.permute.xlu0 %1076 }
0x1612   :  { %v1079_v1 = vsel %vm30_vm1, %v1077_v0, 0.0 }
0x1613   :  { %1080 = vadd.xlane.f32.xlu1 %v1079_v1 }
0x1618   :  { %v161_v2 = vpop.xlane.xlu1 %160 }
0x161c   :  { %v557_v5 = vpop.xlane.xlu1 %556 }
0x1620   :  { %v819_v8 = vpop.xlane.xlu1 %818 }
0x1624   :  { %v304_v10 = vpop.permute.xlu1 %303  ;;  %958 = vbcast.lane.b32.xlu1 %v1210_v9, 256 }
0x1625   :  { %v306_v11 = vmul.f32 %v304_v10, %v295_v62 }
0x1627   :  { %309 = vperm.xlu0 %1403, %v306_v11  }
0x1628   :  { %v435_v12 = vpop.permute.xlu1 %434 }
0x162c   :  { %v697_v14 = vpop.permute.xlu1 %696 }
0x1642   :  { %v426_v13 = vpop.xlane.xlu0 %425 }
0x1643   :  { %v437_v22 = vmul.f32 %v435_v12, %v426_v13  ;;  %v1114_v12 = vld [vmem:[%s1827_s2] sm:$0xff] }
0x1646   :  { %v688_v15 = vpop.xlane.xlu0 %687 }
0x1647   :  { %v699_v16 = vmul.f32 %v697_v14, %v688_v15 }
0x1649   :  { %702 = vperm.xlu0 %1403, %v699_v16  }
0x164a   :  { %v950_v17 = vpop.xlane.xlu0 %949 }
0x164e   :  { %v170_v18 = vpop.permute.xlu0 %169 }
0x164f   :  { %v172_v19 = vmul.f32 %v170_v18, %v161_v2 }
0x1651   :  { %175 = vperm.xlu1 %1402, %v172_v19  }
0x1652   :  { %v566_v20 = vpop.permute.xlu0 %565 }
0x1653   :  { %v568_v23 = vmul.f32 %v566_v20, %v557_v5 }
0x1655   :  { %440 = vperm.xlu1 %1402, %v437_v22  }
0x1656   :  { %v828_v24 = vpop.permute.xlu0 %827 }
0x1657   :  { %v830_v25 = vmul.f32 %v828_v24, %v819_v8  ;;  %v1149_v24 = vld [vmem:[#allocation4] sm:$0x1] }
0x1659   :  { %571 = vperm.xlu1 %1402, %v568_v23  }
0x165a   :  { %v1090_v28 = vpop.permute.xlu0 %1089 }
0x165d   :  { %833 = vperm.xlu1 %1402, %v830_v25  }
0x16a0   :  { %v1081_v31 = vpop.xlane.xlu1 %1080 }
0x16a1   :  { %v1092_v32 = vmul.f32 %v1090_v28, %v1081_v31 }
0x16a3   :  { %1095 = vperm.xlu1 %1402, %v1092_v32  }
0x16a4   :  { %v959_v35 = vpop.permute.xlu1 %958 }
0x16a5   :  { %v961_v36 = vmul.f32 %v959_v35, %v950_v17 }
0x16a6   :  { %v310_v37 = vpop.permute.xlu0 %309 }
0x16a7   :  { %v314_v38 = vrot.slane %v310_v37, %v181_v34  ;;  %1109 = vrot.lane.b32.xlu1 %v1698_v33, %s1505_s0  ;;  %964 = vperm.xlu0 %1403, %v961_v36  }
0x16a9   :  { %316 = vst.msk [vmem:[%s1831_s6 + $0x1] sm:$0x1] %vm184_vm2, %v314_v38 }
0x16ab   :  { %1104 = vrot.lane.b32.xlu0 %v1717_v40, %s1504_s11 }
0x16c8   :  { %v703_v39 = vpop.permute.xlu0 %702 }
0x16c9   :  { %v707_v41 = vrot.slane %v703_v39, %v181_v34 }
0x16cb   :  { %709 = vst.msk [vmem:[%s1831_s6 + $0x4] sm:$0x1] %vm184_vm2, %v707_v41 }
0x16d0   :  { %v176_v45 = vpop.permute.xlu1 %175 }
0x16d1   :  { %v182_v21 = vrot.slane %v176_v45, %v181_v34 }
0x16d3   :  { %185 = vst.msk [vmem:[%s1831_s6] sm:$0x1] %vm184_vm2, %v182_v21 }
0x16d4   :  { %v441_v33 = vpop.permute.xlu1 %440 }
0x16d5   :  { %v445_v42 = vrot.slane %v441_v33, %v181_v34 }
0x16d7   :  { %447 = vst.msk [vmem:[%s1831_s6 + $0x2] sm:$0x1] %vm184_vm2, %v445_v42 }
0x16d8   :  { %v572_v43 = vpop.permute.xlu1 %571 }
0x16d9   :  { %v576_v44 = vrot.slane %v572_v43, %v181_v34 }
0x16db   :  { %578 = vst.msk [vmem:[%s1831_s6 + $0x3] sm:$0x1] %vm184_vm2, %v576_v44 }
0x16dc   :  { %v834_v46 = vpop.permute.xlu1 %833 }
0x16dd   :  { %v838_v27 = vrot.slane %v834_v46, %v181_v34 }
0x16df   :  { %840 = vst.msk [vmem:[%s1831_s6 + $0x5] sm:$0x1] %vm184_vm2, %v838_v27 }
0x1722   :  { %v1096_v47 = vpop.permute.xlu1 %1095 }
0x1723   :  { %v1100_v63 = vrot.slane %v1096_v47, %v181_v34 }
0x1725   :  { %1102 = vst.msk [vmem:[%s1831_s6 + $0x7] sm:$0x1] %vm184_vm2, %v1100_v63 }
0x1726   :  { %v965_v48 = vpop.permute.xlu0 %964  ;;  %v1110_v40 = vpop.permute.xlu1 %1109 }
0x1727   :  { %v969_v4 = vrot.slane %v965_v48, %v181_v34  ;;  %1112 = vst.msk [vmem:[#allocation3] sm:$0xff] %vm30_vm1, %v1110_v40 }
0x1729   :  { %971 = vst.msk [vmem:[%s1831_s6 + $0x6] sm:$0x1] %vm184_vm2, %v969_v4 }
0x172a   :  { %v1105_v50 = vpop.permute.xlu0 %1104 }
0x172b   :  { %1107 = vst.msk [vmem:[#allocation2] sm:$0xff] %vm30_vm1, %v1105_v50 }
0x1730   :  { %v1115_v7 = vld [vmem:[%s1831_s6] sm:$0xff] }
0x1731   :  { %v1120_v52 = vadd.f32 %v1119_v51, %v1115_v7 }
0x1733   :  { %v1122_v53 = vmin.f32 %v1120_v52, 0.0  ;;  %vm1121_vm4 = vcmp.gt.f32.partialorder %v1120_v52, 0.0 }
0x1735   :  { %v1123_v54 = vmul.f32 1.442695, %v1122_v53 }
0x1737   :  { %1468 = vpow2.f32 %v1123_v54 }
0x1738   :  { %1470 = vrcp.f32 %v1113_v3 }
0x1741   :  { %v1469_v58 = vpop.eup %1468 }
0x1742   :  { %v1215_v60 = vadd.f32 -1.0, %v1469_v58  ;;  %v1471_v2 = vpop.eup %1470 }
0x1743   :  { %v1144_v8 = vrot.slane %v1471_v2, %v1130_v55 }
0x1744   :  { %v1126_v61 = vsel %vm1121_vm4, %v1120_v52, %v1215_v60 }
0x1745   :  { %v1135_v62 = vadd.f32 %v1132_v59, %v1126_v61  ;;  %v1136_v0 = vmul.f32 1.442695, %v1126_v61  ;;  %1148 = vst.msk [vmem:[%s1831_s6] sm:$0xff] %vm1147_vm3, %v1126_v61  ;;  %s1507_s6 = smov [#allocation4]  }
0x1746   :  { %s1173_s2 = sshll.u32 %s1507_s6, 4  ;;  %s1174_s2 = int_to_ptr.vmem [resolvable:$true] %s1173_s2 }
0x1747   :  { %v1138_v1 = vmul.f32 1.442695, %v1135_v62  ;;  %1472 = vpow2.f32 %v1136_v0  ;;  %s1476_s19 = scalar_lea.vmem %s1174_s2, 16  ;;  %s1480_s20 = scalar_lea.vmem %s1174_s2, 32 }
0x1748   :  { %p1477_p0 = scmp.ne.s32.totalorder %s1174_s2, %s1476_s19  ;;  %p1481_p1 = scmp.lt.s32.totalorder %s1174_s2, %s1174_s2 }
0x1749   :  { %1474 = vpow2.f32 %v1138_v1  ;;  %p1482_p2 = scmp.lt.s32.totalorder %s1480_s20, %s1476_s19 }
0x174b   :  { %p1483_p3 = por %p1482_p2, %p1481_p1 }
0x174d   :  { %p1484_p4 = pnand %p1483_p3, %p1477_p0 }
0x1751   :  { %v1473_v5 = vpop.eup %1472 }
0x1753   :  { %v1475_v9 = vpop.eup %1474 }
0x1754   :  { %v1140_v10 = vsub.f32 %v1473_v5, %v1475_v9 }
0x1756   :  { %v1145_v11 = vmul.f32 %v1144_v8, %v1140_v10 }
0x1758   :  { %v1146_v13 = vadd.f32 %v1145_v11, %v1135_v62 }
0x175a   :  { %v1150_v14 = vmul.f32 %v1146_v13, %v1114_v12 }
0x175c   :  { %v1151_v15 = vsel %vm1147_vm3, %v1150_v14, 0.0 }
0x175d   :  { %1152 = vadd.xlane.f32.xlu0 %v1151_v15 }
0x17ea   :  { %v1153_v16 = vpop.xlane.xlu0 %1152 }
0x17eb   :  { %v1154_v17 = vrot.slane %v1153_v16, 4 }
0x17ed   :  { %v1155_v18 = vadd.f32 %v1154_v17, %v1153_v16 }
0x17ef   :  { %v1156_v19 = vrot.slane %v1155_v18, 2 }
0x17f1   :  { %v1157_v20 = vadd.f32 %v1156_v19, %v1155_v18 }
0x17f3   :  { %v1158_v22 = vrot.slane %v1157_v20, 1 }
0x17f5   :  { %v1159_v23 = vadd.f32 %v1158_v22, %v1157_v20 }
0x17f7   :  { %1392 = vpush %v1159_v23 }
0x1828   :  { %s1393_s18 = spop %1392 }
0x1829   :  { %v1161_v25 = vstv %s1393_s18 }
0x182a   :  { %v1162_v26 = vadd.f32 %v1161_v25, %v1149_v24 }
0x182c   :  { %1164 = vst.msk [vmem:[#allocation4] sm:$0x1] %vm33_vm5, %v1162_v26 }
0x182d   :  { %1487 = shalt.err (!%p1484_p4)
}
0x182e   :  { %s1488_s23 = scalar_lea.hbm %s1832_s7, 16 }
0x182f   :  { %p1489_p5 = scmp.ne.s32.totalorder %s1832_s7, %s1488_s23  ;;  %p1492_p6 = scmp.lt.u32.totalorder %s1488_s23, %s1832_s7 }
0x1831   :  { %p1494_p7 = pnand %p1492_p6, %p1489_p5 }
0x1833   :  { %1497 = shalt.err (!%p1494_p7)
}
0x1834   :  { %1176 = dma.vmem_to_hbm [thread:$0]  %s1174_s2, 16, %s1832_s7, [#allocation5]  }
0x1835   :  { %1498 = dma.done.wait [#allocation5], 16  }
0x1836   :  { %1499 = vsyncadd [#allocation5], 4294967280 }
0x1837   :  { %1182 = vsyncpa [#allocation5], 1 }

</bundles_post_ra>
